<compile_context>
chip_gen: v7x
topology: tpu7x:2x2x1
jax: 0.10.0
libtpu: 0.0.40
codegen_flags: <defaults>
</compile_context>

<pallas_src>
import math
import numpy as np
import jax
import jax.numpy as jnp
from jax import lax
from jax.experimental import pallas as pl
from jax.experimental.pallas import tpu as pltpu


# ---------------------------------------------------------------------------
# Deterministic parameter construction (mirrors NRSSLoss.__init__)
# ---------------------------------------------------------------------------
def _blur_taps_1d(kernel_size=7, sigma=math.sqrt(6)):
    # torch builds the 2-D kernel over range(-k//2, k//2) == [-4..2] (shifted
    # center). It is the outer product of this 1-D vector with itself, so after
    # normalisation blur == separable conv with taps g / g.sum() in each dim.
    rng = np.arange(-kernel_size // 2, kernel_size // 2, dtype=np.float64)
    g = np.exp(-(rng ** 2) / (2.0 * sigma * sigma))
    return (g / g.sum()).astype(np.float32)


def _blur_kernel_7x7(kernel_size=7, sigma=math.sqrt(6)):
    # Faithful 2-D construction (used only by the pure-JAX reference).
    rng = list(range(-kernel_size // 2, kernel_size // 2))
    k = np.array(
        [[math.exp(-(xx * xx + yy * yy) / (2 * sigma * sigma)) / (2 * math.pi * sigma * sigma)
          for xx in rng] for yy in rng],
        dtype=np.float64)
    k /= k.sum()
    return k.astype(np.float32)


def _win_taps_1d(size=11, sigma=1.5):
    c = np.arange(size, dtype=np.float64) - size // 2
    g = np.exp(-(c ** 2) / (2.0 * sigma * sigma))
    return (g / g.sum()).astype(np.float32)


LAPLACE_2D = np.array([[0., 1., 0.], [1., -4., 1.], [0., 1., 0.]], dtype=np.float32)
LAP_TAPS = np.array([1.0, -2.0, 1.0], dtype=np.float32)   # laplace = row 2nd diff + col 2nd diff


def _banded(n_out, n_in, taps, offset):
    """M[i, i + k + offset] = taps[k]  (band truncated at the edges => zero pad)."""
    m = np.zeros((n_out, n_in), dtype=np.float32)
    for i in range(n_out):
        for k in range(len(taps)):
            j = i + k + offset
            if 0 <= j < n_in:
                m[i, j] += float(taps[k])
    return m


# ---------------------------------------------------------------------------
# Pallas kernel (B images per grid step)
# ---------------------------------------------------------------------------
def _make_kernel(B, H, W, Ho, Wo, C1, C2):
    inv_area = 1.0 / float(Ho * Wo)

    def dot32(a, b):
        # TODO(synk): trial bf16 operands with f32 accumulation for the blur and
        # window matmuls (v6e/v7x MXU is a bf16 engine) once re-validated against
        # _ref_nrss_loss: the e_xx - mu1^2 cancellation at data_range=255 is the
        # risk point, so it stays f32 here.
        return jnp.dot(a, b, preferred_element_type=jnp.float32)

    def kernel(x_ref, bv_ref, bh_ref, lv_ref, lh_ref, gv_ref, gh_ref, out_ref):
        Bv = bv_ref[...]
        Bh = bh_ref[...]
        Lv = lv_ref[...]
        Lh = lh_ref[...]
        Gv = gv_ref[...]
        Gh = gh_ref[...]

        x = x_ref[...]                          # (B, H, W) f32
        xf = x.reshape(B * H, W)                # flat batched layout for lane passes

        # Lane-direction (W) passes shared across the whole image batch
        # (one wide MXU matmul each instead of B narrow ones).
        xbh = dot32(xf, Bh)                     # 7-tap blur, horizontal pass
        xlh = dot32(xf, Lh)                     # laplacian horizontal 2nd diff of x

        total = jnp.float32(0.0)
        for b in range(B):                      # static unroll; B is small
            lo = b * H
            x_i = xf[lo:lo + H]                              # (H, W)
            y_i = dot32(Bv, xbh[lo:lo + H])                  # blurred image (vertical pass)
            lx = dot32(Lv, x_i) + xlh[lo:lo + H]             # laplace(x)
            ly = dot32(Lv, y_i) + dot32(y_i, Lh)             # laplace(blur(x))
            # TODO(synk): at large H,W move the 3-tap laplacian off the MXU
            # (pltpu.roll on the XLU + edge-zero masks) to cut wasted MACs and
            # drop the Lv/Lh constants entirely.

            # 11-tap separable SSIM window ("valid"): per-map lane pass, then ONE
            # fused wide sublane matmul over the lane-stacked maps (5*Wo lanes)
            # instead of five narrow (Ho,H)@(H,Wo) matmuls.
            u = jnp.concatenate(
                [dot32(m, Gh) for m in (lx, ly, lx * lx, ly * ly, lx * ly)],
                axis=1)                                       # (H, 5*Wo)
            v = dot32(Gv, u)                                  # (Ho, 5*Wo)

            mu1 = v[:, 0 * Wo:1 * Wo]
            mu2 = v[:, 1 * Wo:2 * Wo]
            e_xx = v[:, 2 * Wo:3 * Wo]
            e_yy = v[:, 3 * Wo:4 * Wo]
            e_xy = v[:, 4 * Wo:5 * Wo]

            mu1_sq = mu1 * mu1
            mu2_sq = mu2 * mu2
            mu1_mu2 = mu1 * mu2
            s1 = e_xx - mu1_sq
            s2 = e_yy - mu2_sq
            s12 = e_xy - mu1_mu2

            # Divisions -> EUP approx reciprocal (C1~6.5 / C2~58.5 regularize the
            # denominators, so the approximation error is tiny).
            cs_map = (2.0 * s12 + C2) * pl.reciprocal(s1 + s2 + C2, approx=True)
            ssim_map = ((2.0 * mu1_mu2 + C1)
                        * pl.reciprocal(mu1_sq + mu2_sq + C1, approx=True)
                        * cs_map)

            val = jnp.sum(ssim_map) * jnp.float32(inv_area)   # per-channel mean (C = 1)
            total = total + jnp.maximum(val, jnp.float32(0.0))  # nonnegative_ssim=True

        # One lane-dense (1,1,128) store of this step's partial sum of relu(ssim).
        out_ref[...] = jnp.broadcast_to(total, out_ref.shape).astype(out_ref.dtype)

    return kernel


# ---------------------------------------------------------------------------
# Wrapper
# ---------------------------------------------------------------------------
def _pick_batch(N, H, W):
    """Largest divisor of N (capped by a VMEM budget and 8) that still leaves a
    grid of length >= 2 so both v7x TensorCores stay busy."""
    img_bytes = H * W * 4
    max_b = int(max(1, min(8, (4 * 1024 * 1024) // max(1, 8 * img_bytes))))
    best_multi, best_any = 1, 1
    for b in range(1, min(N, max_b) + 1):
        if N % b:
            continue
        best_any = b
        if N // b >= 2:
            best_multi = b
    return best_multi if N >= 2 else best_any


def nrss_loss(x, loss_weight=1.0, data_range=255.0, K=(0.01, 0.03)):
    N, C, H, W = x.shape
    assert C == 1, "NRSSLoss (chanel=1) requires single-channel NCHW input"
    assert H >= 11 and W >= 11, "SSIM window of 11 requires H, W >= 11"
    Ho, Wo = H - 11 + 1, W - 11 + 1

    C1 = float((K[0] * data_range) ** 2)
    C2 = float((K[1] * data_range) ** 2)

    g_blur = _blur_taps_1d()
    g_win = _win_taps_1d()

    # Banded constant matrices: zero padding is encoded by truncating the bands.
    bv = jnp.asarray(_banded(H, H, g_blur, -3))            # blur:    y = Bv @ x @ Bh
    bh = jnp.asarray(_banded(W, W, g_blur, -3).T)
    lv = jnp.asarray(_banded(H, H, LAP_TAPS, -1))          # laplace: Lv @ a + a @ Lh
    lh = jnp.asarray(_banded(W, W, LAP_TAPS, -1).T)
    gv = jnp.asarray(_banded(Ho, H, g_win, 0))             # ssim win ("valid"): Gv @ a @ Gh
    gh = jnp.asarray(_banded(Wo, W, g_win, 0).T)

    Bimg = _pick_batch(N, H, W)                            # images per grid step
    Gsteps = N // Bimg

    x3 = x[:, 0].astype(jnp.float32)                       # (N, H, W)

    # VMEM footprint: double-buffered image/out blocks, single-buffered constants
    # (counted twice for the fallback path), plus in-kernel temporaries; 3x margin,
    # capped well below a v7x core's 64 MiB physical VMEM.
    const_elems = 2 * H * H + 2 * W * W + Ho * H + W * Wo
    block_elems = 2 * Bimg * H * W + 2 * 128
    temp_elems = 4 * Bimg * H * W + 14 * H * W + 8 * H * Wo + 12 * Ho * Wo
    need_bytes = 4 * (2 * const_elems + block_elems + temp_elems)
    try:
        cap = int(0.75 * pltpu.get_tpu_info().vmem_capacity_bytes)
    except Exception:
        cap = 48 * 1024 * 1024
    cap = min(cap, 48 * 1024 * 1024)
    vmem_limit = int(min(cap, max(16 * 1024 * 1024, 3 * need_bytes)))

    # TODO(synk): for large images, add an inner "arbitrary" H-strip grid axis
    # with a 9/10-row input halo (blur 3 + laplace 1 + window 5 each side),
    # accumulating the ssim_map partial sum in a VMEM scratch with pl.when
    # init/finalize, to bound per-step VMEM on v7x and shrink the banded
    # matrices to (tile_h, tile_h + halo). Not needed at the demo sizes here.
    kern = _make_kernel(Bimg, H, W, Ho, Wo, C1, C2)

    def run(single_buffer_consts):
        kw = {"pipeline_mode": pl.Buffered(1)} if single_buffer_consts else {}

        def cspec(shape):
            return pl.BlockSpec(shape, lambda g: (0, 0), **kw)

        return pl.pallas_call(
            kern,
            out_shape=jax.ShapeDtypeStruct((Gsteps, 1, 128), jnp.float32),
            grid=(Gsteps,),
            in_specs=[
                pl.BlockSpec((Bimg, H, W), lambda g: (g, 0, 0)),  # B images / step
                cspec((H, H)),        # Bv  (constant, never re-fetched)
                cspec((W, W)),        # Bh
                cspec((H, H)),        # Lv
                cspec((W, W)),        # Lh
                cspec((Ho, H)),       # Gv
                cspec((W, Wo)),       # Gh
            ],
            out_specs=pl.BlockSpec((1, 1, 128), lambda g: (g, 0, 0)),
            compiler_params=pltpu.CompilerParams(
                dimension_semantics=("parallel",),        # v7x: shard steps over 2 TCs
                vmem_limit_bytes=vmem_limit),
        )(x3, bv, bh, lv, lh, gv, gh)

    try:
        out = run(True)       # single-buffered constant matrices
    except Exception:
        out = run(False)      # fallback if Buffered(1) is not supported here

    partial = out[:, 0, 0]    # per-step sum of relu(per-image SSIM mean)
    return jnp.float32(loss_weight) * jnp.sum(partial) / jnp.float32(N)


# ---------------------------------------------------------------------------
# Pure-JAX reference (lax conv, highest precision) for a sanity check
# ---------------------------------------------------------------------------
def _ref_nrss_loss(x, loss_weight=1.0, data_range=255.0, K=(0.01, 0.03)):
    N, C, H, W = x.shape
    x = x.astype(jnp.float32)
    dn = ('NCHW', 'OIHW', 'NCHW')
    blur_w = jnp.asarray(_blur_kernel_7x7()).reshape(1, 1, 7, 7)
    lap_w = jnp.asarray(LAPLACE_2D).reshape(1, 1, 3, 3)
    win = jnp.asarray(_win_taps_1d())
    win_h = win.reshape(1, 1, 11, 1)
    win_w = win.reshape(1, 1, 1, 11)

    def conv(inp, w, pad):
        return lax.conv_general_dilated(inp, w, (1, 1), [(pad, pad), (pad, pad)],
                                        dimension_numbers=dn,
                                        precision=lax.Precision.HIGHEST)

    y = conv(x, blur_w, 3)
    lx = conv(x, lap_w, 1)
    ly = conv(y, lap_w, 1)

    def gf(a):
        a = conv(a, win_h, 0)
        return conv(a, win_w, 0)

    C1 = (K[0] * data_range) ** 2
    C2 = (K[1] * data_range) ** 2
    mu1, mu2 = gf(lx), gf(ly)
    mu1_sq, mu2_sq, mu1_mu2 = mu1 * mu1, mu2 * mu2, mu1 * mu2
    s1 = gf(lx * lx) - mu1_sq
    s2 = gf(ly * ly) - mu2_sq
    s12 = gf(lx * ly) - mu1_mu2
    cs = (2 * s12 + C2) / (s1 + s2 + C2)
    sm = (2 * mu1_mu2 + C1) / (mu1_sq + mu2_sq + C1) * cs
    spc = sm.reshape(N, C, -1).mean(-1)
    spc = jnp.maximum(spc, 0.0)
    return jnp.float32(loss_weight) * spc.mean()


if __name__ == "__main__":
    key = jax.random.PRNGKey(0)
    # (N=4, C=1, H=16, W=16), image-range values (data_range=255).
    # N=4 -> 2 images per grid step, grid length 2 (keeps both v7x TCs busy).
    x = jax.random.uniform(key, (4, 1, 16, 16), dtype=jnp.float32) * 255.0

    loss = jax.block_until_ready(nrss_loss(x))
    ref = jax.block_until_ready(_ref_nrss_loss(x))

    assert jnp.isfinite(loss), loss
    # Slightly looser tolerance than pure-f32 to accommodate the EUP approx
    # reciprocals (still far tighter than any real formulation error).
    assert jnp.allclose(loss, ref, rtol=5e-3, atol=5e-3), (float(loss), float(ref))
    print("KERNEL_OK")
</pallas_src>

<mosaic_0001>
module attributes {stable_mosaic.version = 11 : i64} {
  func.func @kernel(%arg0: i32, %arg1: memref<2x16x16xf32, #tpu.memory_space<vmem>>, %arg2: memref<16x16xf32, #tpu.memory_space<vmem>>, %arg3: memref<16x16xf32, #tpu.memory_space<vmem>>, %arg4: memref<16x16xf32, #tpu.memory_space<vmem>>, %arg5: memref<16x16xf32, #tpu.memory_space<vmem>>, %arg6: memref<6x16xf32, #tpu.memory_space<vmem>>, %arg7: memref<16x6xf32, #tpu.memory_space<vmem>>, %arg8: memref<1x1x128xf32, #tpu.memory_space<vmem>>) attributes {dimension_semantics = [#tpu.dimension_semantics<parallel>], iteration_bounds = array<i64: 2>, scalar_prefetch = 0 : i64, scratch_operands = 0 : i64, tpu.core_type = #tpu.core_type<tc>, window_params = [{transform_indices = @transform_0, window_bounds = array<i64: 2, 16, 16>}, {pipeline_mode = #tpu.pipeline_mode<synchronous>, transform_indices = @transform_1, window_bounds = array<i64: 16, 16>}, {pipeline_mode = #tpu.pipeline_mode<synchronous>, transform_indices = @transform_2, window_bounds = array<i64: 16, 16>}, {pipeline_mode = #tpu.pipeline_mode<synchronous>, transform_indices = @transform_3, window_bounds = array<i64: 16, 16>}, {pipeline_mode = #tpu.pipeline_mode<synchronous>, transform_indices = @transform_4, window_bounds = array<i64: 16, 16>}, {pipeline_mode = #tpu.pipeline_mode<synchronous>, transform_indices = @transform_5, window_bounds = array<i64: 6, 16>}, {pipeline_mode = #tpu.pipeline_mode<synchronous>, transform_indices = @transform_6, window_bounds = array<i64: 16, 6>}, {transform_indices = @transform_7, window_bounds = array<i64: 1, 1, 128>}]} {
    %c0 = arith.constant 0 : index
    %c0_0 = arith.constant 0 : index
    %0 = vector.load %arg2[%c0, %c0_0] : memref<16x16xf32, #tpu.memory_space<vmem>>, vector<16x16xf32>
    %c0_1 = arith.constant 0 : index
    %c0_2 = arith.constant 0 : index
    %1 = vector.load %arg3[%c0_1, %c0_2] : memref<16x16xf32, #tpu.memory_space<vmem>>, vector<16x16xf32>
    %c0_3 = arith.constant 0 : index
    %c0_4 = arith.constant 0 : index
    %2 = vector.load %arg4[%c0_3, %c0_4] : memref<16x16xf32, #tpu.memory_space<vmem>>, vector<16x16xf32>
    %c0_5 = arith.constant 0 : index
    %c0_6 = arith.constant 0 : index
    %3 = vector.load %arg5[%c0_5, %c0_6] : memref<16x16xf32, #tpu.memory_space<vmem>>, vector<16x16xf32>
    %c0_7 = arith.constant 0 : index
    %c0_8 = arith.constant 0 : index
    %4 = vector.load %arg6[%c0_7, %c0_8] : memref<6x16xf32, #tpu.memory_space<vmem>>, vector<6x16xf32>
    %c0_9 = arith.constant 0 : index
    %c0_10 = arith.constant 0 : index
    %5 = vector.load %arg7[%c0_9, %c0_10] : memref<16x6xf32, #tpu.memory_space<vmem>>, vector<16x6xf32>
    %c0_11 = arith.constant 0 : index
    %c0_12 = arith.constant 0 : index
    %c0_13 = arith.constant 0 : index
    %6 = vector.load %arg1[%c0_11, %c0_12, %c0_13] : memref<2x16x16xf32, #tpu.memory_space<vmem>>, vector<2x16x16xf32>
    %7 = vector.shape_cast %6 : vector<2x16x16xf32> to vector<32x16xf32>
    %cst = arith.constant dense<0.000000e+00> : vector<32x16xf32>
    %8 = tpu.matmul %7, %1, %cst {dimension_numbers = #tpu.dot_dimension_numbers<[1], [0], [0], [1], [0, 0, 1, 1], [], []>} : vector<32x16xf32>, vector<16x16xf32>, vector<32x16xf32> -> vector<32x16xf32>
    %cst_14 = arith.constant dense<0.000000e+00> : vector<32x16xf32>
    %9 = tpu.matmul %7, %3, %cst_14 {dimension_numbers = #tpu.dot_dimension_numbers<[1], [0], [0], [1], [0, 0, 1, 1], [], []>} : vector<32x16xf32>, vector<16x16xf32>, vector<32x16xf32> -> vector<32x16xf32>
    %10 = vector.extract_strided_slice %7 {offsets = [0, 0], sizes = [16, 16], strides = [1, 1]} : vector<32x16xf32> to vector<16x16xf32>
    %11 = vector.extract_strided_slice %8 {offsets = [0, 0], sizes = [16, 16], strides = [1, 1]} : vector<32x16xf32> to vector<16x16xf32>
    %cst_15 = arith.constant dense<0.000000e+00> : vector<16x16xf32>
    %12 = tpu.matmul %0, %11, %cst_15 {dimension_numbers = #tpu.dot_dimension_numbers<[1], [0], [0], [1], [0, 0, 1, 1], [], []>} : vector<16x16xf32>, vector<16x16xf32>, vector<16x16xf32> -> vector<16x16xf32>
    %cst_16 = arith.constant dense<0.000000e+00> : vector<16x16xf32>
    %13 = tpu.matmul %2, %10, %cst_16 {dimension_numbers = #tpu.dot_dimension_numbers<[1], [0], [0], [1], [0, 0, 1, 1], [], []>} : vector<16x16xf32>, vector<16x16xf32>, vector<16x16xf32> -> vector<16x16xf32>
    %14 = vector.extract_strided_slice %9 {offsets = [0, 0], sizes = [16, 16], strides = [1, 1]} : vector<32x16xf32> to vector<16x16xf32>
    %15 = arith.addf %13, %14 : vector<16x16xf32>
    %cst_17 = arith.constant dense<0.000000e+00> : vector<16x16xf32>
    %16 = tpu.matmul %2, %12, %cst_17 {dimension_numbers = #tpu.dot_dimension_numbers<[1], [0], [0], [1], [0, 0, 1, 1], [], []>} : vector<16x16xf32>, vector<16x16xf32>, vector<16x16xf32> -> vector<16x16xf32>
    %cst_18 = arith.constant dense<0.000000e+00> : vector<16x16xf32>
    %17 = tpu.matmul %12, %3, %cst_18 {dimension_numbers = #tpu.dot_dimension_numbers<[1], [0], [0], [1], [0, 0, 1, 1], [], []>} : vector<16x16xf32>, vector<16x16xf32>, vector<16x16xf32> -> vector<16x16xf32>
    %18 = arith.addf %16, %17 : vector<16x16xf32>
    %19 = arith.mulf %15, %15 : vector<16x16xf32>
    %20 = arith.mulf %18, %18 : vector<16x16xf32>
    %21 = arith.mulf %15, %18 : vector<16x16xf32>
    %cst_19 = arith.constant dense<0.000000e+00> : vector<16x6xf32>
    %22 = tpu.matmul %15, %5, %cst_19 {dimension_numbers = #tpu.dot_dimension_numbers<[1], [0], [0], [1], [0, 0, 1, 1], [], []>} : vector<16x16xf32>, vector<16x6xf32>, vector<16x6xf32> -> vector<16x6xf32>
    %cst_20 = arith.constant dense<0.000000e+00> : vector<16x6xf32>
    %23 = tpu.matmul %18, %5, %cst_20 {dimension_numbers = #tpu.dot_dimension_numbers<[1], [0], [0], [1], [0, 0, 1, 1], [], []>} : vector<16x16xf32>, vector<16x6xf32>, vector<16x6xf32> -> vector<16x6xf32>
    %cst_21 = arith.constant dense<0.000000e+00> : vector<16x6xf32>
    %24 = tpu.matmul %19, %5, %cst_21 {dimension_numbers = #tpu.dot_dimension_numbers<[1], [0], [0], [1], [0, 0, 1, 1], [], []>} : vector<16x16xf32>, vector<16x6xf32>, vector<16x6xf32> -> vector<16x6xf32>
    %cst_22 = arith.constant dense<0.000000e+00> : vector<16x6xf32>
    %25 = tpu.matmul %20, %5, %cst_22 {dimension_numbers = #tpu.dot_dimension_numbers<[1], [0], [0], [1], [0, 0, 1, 1], [], []>} : vector<16x16xf32>, vector<16x6xf32>, vector<16x6xf32> -> vector<16x6xf32>
    %cst_23 = arith.constant dense<0.000000e+00> : vector<16x6xf32>
    %26 = tpu.matmul %21, %5, %cst_23 {dimension_numbers = #tpu.dot_dimension_numbers<[1], [0], [0], [1], [0, 0, 1, 1], [], []>} : vector<16x16xf32>, vector<16x6xf32>, vector<16x6xf32> -> vector<16x6xf32>
    %27 = tpu.concatenate %22, %23, %24, %25, %26 in 1 : vector<16x6xf32>, vector<16x6xf32>, vector<16x6xf32>, vector<16x6xf32>, vector<16x6xf32> -> vector<16x30xf32>
    %cst_24 = arith.constant dense<0.000000e+00> : vector<6x30xf32>
    %28 = tpu.matmul %4, %27, %cst_24 {dimension_numbers = #tpu.dot_dimension_numbers<[1], [0], [0], [1], [0, 0, 1, 1], [], []>} : vector<6x16xf32>, vector<16x30xf32>, vector<6x30xf32> -> vector<6x30xf32>
    %29 = vector.extract_strided_slice %28 {offsets = [0, 0], sizes = [6, 6], strides = [1, 1]} : vector<6x30xf32> to vector<6x6xf32>
    %30 = vector.extract_strided_slice %28 {offsets = [0, 6], sizes = [6, 6], strides = [1, 1]} : vector<6x30xf32> to vector<6x6xf32>
    %31 = vector.extract_strided_slice %28 {offsets = [0, 12], sizes = [6, 6], strides = [1, 1]} : vector<6x30xf32> to vector<6x6xf32>
    %32 = vector.extract_strided_slice %28 {offsets = [0, 18], sizes = [6, 6], strides = [1, 1]} : vector<6x30xf32> to vector<6x6xf32>
    %33 = vector.extract_strided_slice %28 {offsets = [0, 24], sizes = [6, 6], strides = [1, 1]} : vector<6x30xf32> to vector<6x6xf32>
    %34 = arith.mulf %29, %29 : vector<6x6xf32>
    %35 = arith.mulf %30, %30 : vector<6x6xf32>
    %36 = arith.mulf %29, %30 : vector<6x6xf32>
    %37 = arith.subf %31, %34 : vector<6x6xf32>
    %38 = arith.subf %32, %35 : vector<6x6xf32>
    %39 = arith.subf %33, %36 : vector<6x6xf32>
    %cst_25 = arith.constant 2.000000e+00 : f32
    %40 = vector.broadcast %cst_25 : f32 to vector<6x6xf32>
    %41 = arith.mulf %40, %39 : vector<6x6xf32>
    %cst_26 = arith.constant 5.852250e+01 : f32
    %42 = vector.broadcast %cst_26 : f32 to vector<6x6xf32>
    %43 = arith.addf %41, %42 : vector<6x6xf32>
    %44 = arith.addf %37, %38 : vector<6x6xf32>
    %cst_27 = arith.constant 5.852250e+01 : f32
    %45 = vector.broadcast %cst_27 : f32 to vector<6x6xf32>
    %46 = arith.addf %44, %45 : vector<6x6xf32>
    %47 = tpu.reciprocal %46 {approx = true} : vector<6x6xf32> -> vector<6x6xf32>
    %48 = arith.mulf %43, %47 : vector<6x6xf32>
    %cst_28 = arith.constant 2.000000e+00 : f32
    %49 = vector.broadcast %cst_28 : f32 to vector<6x6xf32>
    %50 = arith.mulf %49, %36 : vector<6x6xf32>
    %cst_29 = arith.constant 6.502500e+00 : f32
    %51 = vector.broadcast %cst_29 : f32 to vector<6x6xf32>
    %52 = arith.addf %50, %51 : vector<6x6xf32>
    %53 = arith.addf %34, %35 : vector<6x6xf32>
    %cst_30 = arith.constant 6.502500e+00 : f32
    %54 = vector.broadcast %cst_30 : f32 to vector<6x6xf32>
    %55 = arith.addf %53, %54 : vector<6x6xf32>
    %56 = tpu.reciprocal %55 {approx = true} : vector<6x6xf32> -> vector<6x6xf32>
    %57 = arith.mulf %52, %56 : vector<6x6xf32>
    %58 = arith.mulf %57, %48 : vector<6x6xf32>
    %59 = vector.shape_cast %58 : vector<6x6xf32> to vector<1x6x6xf32>
    %cst_31 = arith.constant dense<0.000000e+00> : vector<1xf32>
    %60 = vector.multi_reduction <add>, %59, %cst_31 [1, 2] : vector<1x6x6xf32> to vector<1xf32>
    %61 = vector.shape_cast %60 : vector<1xf32> to vector<1x1x1xf32>
    %62 = vector.extract %61[0, 0, 0] : f32 from vector<1x1x1xf32>
    %cst_32 = arith.constant 0.027777778 : f32
    %63 = arith.mulf %62, %cst_32 : f32
    %cst_33 = arith.constant 0.000000e+00 : f32
    %64 = arith.maximumf %63, %cst_33 : f32
    %cst_34 = arith.constant 0.000000e+00 : f32
    %65 = arith.addf %cst_34, %64 : f32
    %66 = vector.extract_strided_slice %7 {offsets = [16, 0], sizes = [16, 16], strides = [1, 1]} : vector<32x16xf32> to vector<16x16xf32>
    %67 = vector.extract_strided_slice %8 {offsets = [16, 0], sizes = [16, 16], strides = [1, 1]} : vector<32x16xf32> to vector<16x16xf32>
    %cst_35 = arith.constant dense<0.000000e+00> : vector<16x16xf32>
    %68 = tpu.matmul %0, %67, %cst_35 {dimension_numbers = #tpu.dot_dimension_numbers<[1], [0], [0], [1], [0, 0, 1, 1], [], []>} : vector<16x16xf32>, vector<16x16xf32>, vector<16x16xf32> -> vector<16x16xf32>
    %cst_36 = arith.constant dense<0.000000e+00> : vector<16x16xf32>
    %69 = tpu.matmul %2, %66, %cst_36 {dimension_numbers = #tpu.dot_dimension_numbers<[1], [0], [0], [1], [0, 0, 1, 1], [], []>} : vector<16x16xf32>, vector<16x16xf32>, vector<16x16xf32> -> vector<16x16xf32>
    %70 = vector.extract_strided_slice %9 {offsets = [16, 0], sizes = [16, 16], strides = [1, 1]} : vector<32x16xf32> to vector<16x16xf32>
    %71 = arith.addf %69, %70 : vector<16x16xf32>
    %cst_37 = arith.constant dense<0.000000e+00> : vector<16x16xf32>
    %72 = tpu.matmul %2, %68, %cst_37 {dimension_numbers = #tpu.dot_dimension_numbers<[1], [0], [0], [1], [0, 0, 1, 1], [], []>} : vector<16x16xf32>, vector<16x16xf32>, vector<16x16xf32> -> vector<16x16xf32>
    %cst_38 = arith.constant dense<0.000000e+00> : vector<16x16xf32>
    %73 = tpu.matmul %68, %3, %cst_38 {dimension_numbers = #tpu.dot_dimension_numbers<[1], [0], [0], [1], [0, 0, 1, 1], [], []>} : vector<16x16xf32>, vector<16x16xf32>, vector<16x16xf32> -> vector<16x16xf32>
    %74 = arith.addf %72, %73 : vector<16x16xf32>
    %75 = arith.mulf %71, %71 : vector<16x16xf32>
    %76 = arith.mulf %74, %74 : vector<16x16xf32>
    %77 = arith.mulf %71, %74 : vector<16x16xf32>
    %cst_39 = arith.constant dense<0.000000e+00> : vector<16x6xf32>
    %78 = tpu.matmul %71, %5, %cst_39 {dimension_numbers = #tpu.dot_dimension_numbers<[1], [0], [0], [1], [0, 0, 1, 1], [], []>} : vector<16x16xf32>, vector<16x6xf32>, vector<16x6xf32> -> vector<16x6xf32>
    %cst_40 = arith.constant dense<0.000000e+00> : vector<16x6xf32>
    %79 = tpu.matmul %74, %5, %cst_40 {dimension_numbers = #tpu.dot_dimension_numbers<[1], [0], [0], [1], [0, 0, 1, 1], [], []>} : vector<16x16xf32>, vector<16x6xf32>, vector<16x6xf32> -> vector<16x6xf32>
    %cst_41 = arith.constant dense<0.000000e+00> : vector<16x6xf32>
    %80 = tpu.matmul %75, %5, %cst_41 {dimension_numbers = #tpu.dot_dimension_numbers<[1], [0], [0], [1], [0, 0, 1, 1], [], []>} : vector<16x16xf32>, vector<16x6xf32>, vector<16x6xf32> -> vector<16x6xf32>
    %cst_42 = arith.constant dense<0.000000e+00> : vector<16x6xf32>
    %81 = tpu.matmul %76, %5, %cst_42 {dimension_numbers = #tpu.dot_dimension_numbers<[1], [0], [0], [1], [0, 0, 1, 1], [], []>} : vector<16x16xf32>, vector<16x6xf32>, vector<16x6xf32> -> vector<16x6xf32>
    %cst_43 = arith.constant dense<0.000000e+00> : vector<16x6xf32>
    %82 = tpu.matmul %77, %5, %cst_43 {dimension_numbers = #tpu.dot_dimension_numbers<[1], [0], [0], [1], [0, 0, 1, 1], [], []>} : vector<16x16xf32>, vector<16x6xf32>, vector<16x6xf32> -> vector<16x6xf32>
    %83 = tpu.concatenate %78, %79, %80, %81, %82 in 1 : vector<16x6xf32>, vector<16x6xf32>, vector<16x6xf32>, vector<16x6xf32>, vector<16x6xf32> -> vector<16x30xf32>
    %cst_44 = arith.constant dense<0.000000e+00> : vector<6x30xf32>
    %84 = tpu.matmul %4, %83, %cst_44 {dimension_numbers = #tpu.dot_dimension_numbers<[1], [0], [0], [1], [0, 0, 1, 1], [], []>} : vector<6x16xf32>, vector<16x30xf32>, vector<6x30xf32> -> vector<6x30xf32>
    %85 = vector.extract_strided_slice %84 {offsets = [0, 0], sizes = [6, 6], strides = [1, 1]} : vector<6x30xf32> to vector<6x6xf32>
    %86 = vector.extract_strided_slice %84 {offsets = [0, 6], sizes = [6, 6], strides = [1, 1]} : vector<6x30xf32> to vector<6x6xf32>
    %87 = vector.extract_strided_slice %84 {offsets = [0, 12], sizes = [6, 6], strides = [1, 1]} : vector<6x30xf32> to vector<6x6xf32>
    %88 = vector.extract_strided_slice %84 {offsets = [0, 18], sizes = [6, 6], strides = [1, 1]} : vector<6x30xf32> to vector<6x6xf32>
    %89 = vector.extract_strided_slice %84 {offsets = [0, 24], sizes = [6, 6], strides = [1, 1]} : vector<6x30xf32> to vector<6x6xf32>
    %90 = arith.mulf %85, %85 : vector<6x6xf32>
    %91 = arith.mulf %86, %86 : vector<6x6xf32>
    %92 = arith.mulf %85, %86 : vector<6x6xf32>
    %93 = arith.subf %87, %90 : vector<6x6xf32>
    %94 = arith.subf %88, %91 : vector<6x6xf32>
    %95 = arith.subf %89, %92 : vector<6x6xf32>
    %cst_45 = arith.constant 2.000000e+00 : f32
    %96 = vector.broadcast %cst_45 : f32 to vector<6x6xf32>
    %97 = arith.mulf %96, %95 : vector<6x6xf32>
    %cst_46 = arith.constant 5.852250e+01 : f32
    %98 = vector.broadcast %cst_46 : f32 to vector<6x6xf32>
    %99 = arith.addf %97, %98 : vector<6x6xf32>
    %100 = arith.addf %93, %94 : vector<6x6xf32>
    %cst_47 = arith.constant 5.852250e+01 : f32
    %101 = vector.broadcast %cst_47 : f32 to vector<6x6xf32>
    %102 = arith.addf %100, %101 : vector<6x6xf32>
    %103 = tpu.reciprocal %102 {approx = true} : vector<6x6xf32> -> vector<6x6xf32>
    %104 = arith.mulf %99, %103 : vector<6x6xf32>
    %cst_48 = arith.constant 2.000000e+00 : f32
    %105 = vector.broadcast %cst_48 : f32 to vector<6x6xf32>
    %106 = arith.mulf %105, %92 : vector<6x6xf32>
    %cst_49 = arith.constant 6.502500e+00 : f32
    %107 = vector.broadcast %cst_49 : f32 to vector<6x6xf32>
    %108 = arith.addf %106, %107 : vector<6x6xf32>
    %109 = arith.addf %90, %91 : vector<6x6xf32>
    %cst_50 = arith.constant 6.502500e+00 : f32
    %110 = vector.broadcast %cst_50 : f32 to vector<6x6xf32>
    %111 = arith.addf %109, %110 : vector<6x6xf32>
    %112 = tpu.reciprocal %111 {approx = true} : vector<6x6xf32> -> vector<6x6xf32>
    %113 = arith.mulf %108, %112 : vector<6x6xf32>
    %114 = arith.mulf %113, %104 : vector<6x6xf32>
    %115 = vector.shape_cast %114 : vector<6x6xf32> to vector<1x6x6xf32>
    %cst_51 = arith.constant dense<0.000000e+00> : vector<1xf32>
    %116 = vector.multi_reduction <add>, %115, %cst_51 [1, 2] : vector<1x6x6xf32> to vector<1xf32>
    %117 = vector.shape_cast %116 : vector<1xf32> to vector<1x1x1xf32>
    %118 = vector.extract %117[0, 0, 0] : f32 from vector<1x1x1xf32>
    %cst_52 = arith.constant 0.027777778 : f32
    %119 = arith.mulf %118, %cst_52 : f32
    %cst_53 = arith.constant 0.000000e+00 : f32
    %120 = arith.maximumf %119, %cst_53 : f32
    %121 = arith.addf %65, %120 : f32
    %122 = vector.broadcast %121 : f32 to vector<1x1x128xf32>
    %c0_54 = arith.constant 0 : index
    %c0_55 = arith.constant 0 : index
    %c0_56 = arith.constant 0 : index
    %123 = vector.load %arg8[%c0_54, %c0_55, %c0_56] : memref<1x1x128xf32, #tpu.memory_space<vmem>>, vector<1x1x128xf32>
    tpu.vector_store %arg8[%c0_54, %c0_55, %c0_56], %122 {strides = array<i32>} : memref<1x1x128xf32, #tpu.memory_space<vmem>>, vector<1x1x128xf32>,
    return
  }
  func.func @transform_0(%arg0: i32) -> (i32, i32, i32) {
    %c0_i32 = arith.constant 0 : i32
    %c0_i32_0 = arith.constant 0 : i32
    %c0_i32_1 = arith.constant 0 : i32
    return %arg0, %c0_i32, %c0_i32_0 : i32, i32, i32
  }
  func.func @transform_1(%arg0: i32) -> (i32, i32) {
    %c0_i32 = arith.constant 0 : i32
    %c0_i32_0 = arith.constant 0 : i32
    %c0_i32_1 = arith.constant 0 : i32
    return %c0_i32, %c0_i32_0 : i32, i32
  }
  func.func @transform_2(%arg0: i32) -> (i32, i32) {
    %c0_i32 = arith.constant 0 : i32
    %c0_i32_0 = arith.constant 0 : i32
    %c0_i32_1 = arith.constant 0 : i32
    return %c0_i32, %c0_i32_0 : i32, i32
  }
  func.func @transform_3(%arg0: i32) -> (i32, i32) {
    %c0_i32 = arith.constant 0 : i32
    %c0_i32_0 = arith.constant 0 : i32
    %c0_i32_1 = arith.constant 0 : i32
    return %c0_i32, %c0_i32_0 : i32, i32
  }
  func.func @transform_4(%arg0: i32) -> (i32, i32) {
    %c0_i32 = arith.constant 0 : i32
    %c0_i32_0 = arith.constant 0 : i32
    %c0_i32_1 = arith.constant 0 : i32
    return %c0_i32, %c0_i32_0 : i32, i32
  }
  func.func @transform_5(%arg0: i32) -> (i32, i32) {
    %c0_i32 = arith.constant 0 : i32
    %c0_i32_0 = arith.constant 0 : i32
    %c0_i32_1 = arith.constant 0 : i32
    return %c0_i32, %c0_i32_0 : i32, i32
  }
  func.func @transform_6(%arg0: i32) -> (i32, i32) {
    %c0_i32 = arith.constant 0 : i32
    %c0_i32_0 = arith.constant 0 : i32
    %c0_i32_1 = arith.constant 0 : i32
    return %c0_i32, %c0_i32_0 : i32, i32
  }
  func.func @transform_7(%arg0: i32) -> (i32, i32, i32) {
    %c0_i32 = arith.constant 0 : i32
    %c0_i32_0 = arith.constant 0 : i32
    %c0_i32_1 = arith.constant 0 : i32
    return %arg0, %c0_i32, %c0_i32_0 : i32, i32, i32
  }
}

module attributes {stable_mosaic.version = 11 : i64} {
  func.func @kernel(%arg0: i32, %arg1: memref<2x16x16xf32, #tpu.memory_space<vmem>>, %arg2: memref<16x16xf32, #tpu.memory_space<vmem>>, %arg3: memref<16x16xf32, #tpu.memory_space<vmem>>, %arg4: memref<16x16xf32, #tpu.memory_space<vmem>>, %arg5: memref<16x16xf32, #tpu.memory_space<vmem>>, %arg6: memref<6x16xf32, #tpu.memory_space<vmem>>, %arg7: memref<16x6xf32, #tpu.memory_space<vmem>>, %arg8: memref<1x1x128xf32, #tpu.memory_space<vmem>>) attributes {dimension_semantics = [#tpu.dimension_semantics<parallel>], iteration_bounds = array<i64: 2>, scalar_prefetch = 0 : i64, scratch_operands = 0 : i64, tpu.core_type = #tpu.core_type<tc>, window_params = [{transform_indices = @transform_0, window_bounds = array<i64: 2, 16, 16>}, {pipeline_mode = #tpu.pipeline_mode<synchronous>, transform_indices = @transform_1, window_bounds = array<i64: 16, 16>}, {pipeline_mode = #tpu.pipeline_mode<synchronous>, transform_indices = @transform_2, window_bounds = array<i64: 16, 16>}, {pipeline_mode = #tpu.pipeline_mode<synchronous>, transform_indices = @transform_3, window_bounds = array<i64: 16, 16>}, {pipeline_mode = #tpu.pipeline_mode<synchronous>, transform_indices = @transform_4, window_bounds = array<i64: 16, 16>}, {pipeline_mode = #tpu.pipeline_mode<synchronous>, transform_indices = @transform_5, window_bounds = array<i64: 6, 16>}, {pipeline_mode = #tpu.pipeline_mode<synchronous>, transform_indices = @transform_6, window_bounds = array<i64: 16, 6>}, {transform_indices = @transform_7, window_bounds = array<i64: 1, 1, 128>}]} {
    %c0 = arith.constant 0 : index
    %c0_0 = arith.constant 0 : index
    %0 = vector.load %arg2[%c0, %c0_0] : memref<16x16xf32, #tpu.memory_space<vmem>>, vector<16x16xf32>
    %c0_1 = arith.constant 0 : index
    %c0_2 = arith.constant 0 : index
    %1 = vector.load %arg3[%c0_1, %c0_2] : memref<16x16xf32, #tpu.memory_space<vmem>>, vector<16x16xf32>
    %c0_3 = arith.constant 0 : index
    %c0_4 = arith.constant 0 : index
    %2 = vector.load %arg4[%c0_3, %c0_4] : memref<16x16xf32, #tpu.memory_space<vmem>>, vector<16x16xf32>
    %c0_5 = arith.constant 0 : index
    %c0_6 = arith.constant 0 : index
    %3 = vector.load %arg5[%c0_5, %c0_6] : memref<16x16xf32, #tpu.memory_space<vmem>>, vector<16x16xf32>
    %c0_7 = arith.constant 0 : index
    %c0_8 = arith.constant 0 : index
    %4 = vector.load %arg6[%c0_7, %c0_8] : memref<6x16xf32, #tpu.memory_space<vmem>>, vector<6x16xf32>
    %c0_9 = arith.constant 0 : index
    %c0_10 = arith.constant 0 : index
    %5 = vector.load %arg7[%c0_9, %c0_10] : memref<16x6xf32, #tpu.memory_space<vmem>>, vector<16x6xf32>
    %c0_11 = arith.constant 0 : index
    %c0_12 = arith.constant 0 : index
    %c0_13 = arith.constant 0 : index
    %6 = vector.load %arg1[%c0_11, %c0_12, %c0_13] : memref<2x16x16xf32, #tpu.memory_space<vmem>>, vector<2x16x16xf32>
    %7 = vector.shape_cast %6 : vector<2x16x16xf32> to vector<32x16xf32>
    %cst = arith.constant dense<0.000000e+00> : vector<32x16xf32>
    %8 = tpu.matmul %7, %1, %cst {dimension_numbers = #tpu.dot_dimension_numbers<[1], [0], [0], [1], [0, 0, 1, 1], [], []>} : vector<32x16xf32>, vector<16x16xf32>, vector<32x16xf32> -> vector<32x16xf32>
    %cst_14 = arith.constant dense<0.000000e+00> : vector<32x16xf32>
    %9 = tpu.matmul %7, %3, %cst_14 {dimension_numbers = #tpu.dot_dimension_numbers<[1], [0], [0], [1], [0, 0, 1, 1], [], []>} : vector<32x16xf32>, vector<16x16xf32>, vector<32x16xf32> -> vector<32x16xf32>
    %10 = vector.extract_strided_slice %7 {offsets = [0, 0], sizes = [16, 16], strides = [1, 1]} : vector<32x16xf32> to vector<16x16xf32>
    %11 = vector.extract_strided_slice %8 {offsets = [0, 0], sizes = [16, 16], strides = [1, 1]} : vector<32x16xf32> to vector<16x16xf32>
    %cst_15 = arith.constant dense<0.000000e+00> : vector<16x16xf32>
    %12 = tpu.matmul %0, %11, %cst_15 {dimension_numbers = #tpu.dot_dimension_numbers<[1], [0], [0], [1], [0, 0, 1, 1], [], []>} : vector<16x16xf32>, vector<16x16xf32>, vector<16x16xf32> -> vector<16x16xf32>
    %cst_16 = arith.constant dense<0.000000e+00> : vector<16x16xf32>
    %13 = tpu.matmul %2, %10, %cst_16 {dimension_numbers = #tpu.dot_dimension_numbers<[1], [0], [0], [1], [0, 0, 1, 1], [], []>} : vector<16x16xf32>, vector<16x16xf32>, vector<16x16xf32> -> vector<16x16xf32>
    %14 = vector.extract_strided_slice %9 {offsets = [0, 0], sizes = [16, 16], strides = [1, 1]} : vector<32x16xf32> to vector<16x16xf32>
    %15 = arith.addf %13, %14 : vector<16x16xf32>
    %cst_17 = arith.constant dense<0.000000e+00> : vector<16x16xf32>
    %16 = tpu.matmul %2, %12, %cst_17 {dimension_numbers = #tpu.dot_dimension_numbers<[1], [0], [0], [1], [0, 0, 1, 1], [], []>} : vector<16x16xf32>, vector<16x16xf32>, vector<16x16xf32> -> vector<16x16xf32>
    %cst_18 = arith.constant dense<0.000000e+00> : vector<16x16xf32>
    %17 = tpu.matmul %12, %3, %cst_18 {dimension_numbers = #tpu.dot_dimension_numbers<[1], [0], [0], [1], [0, 0, 1, 1], [], []>} : vector<16x16xf32>, vector<16x16xf32>, vector<16x16xf32> -> vector<16x16xf32>
    %18 = arith.addf %16, %17 : vector<16x16xf32>
    %19 = arith.mulf %15, %15 : vector<16x16xf32>
    %20 = arith.mulf %18, %18 : vector<16x16xf32>
    %21 = arith.mulf %15, %18 : vector<16x16xf32>
    %cst_19 = arith.constant dense<0.000000e+00> : vector<16x6xf32>
    %22 = tpu.matmul %15, %5, %cst_19 {dimension_numbers = #tpu.dot_dimension_numbers<[1], [0], [0], [1], [0, 0, 1, 1], [], []>} : vector<16x16xf32>, vector<16x6xf32>, vector<16x6xf32> -> vector<16x6xf32>
    %cst_20 = arith.constant dense<0.000000e+00> : vector<16x6xf32>
    %23 = tpu.matmul %18, %5, %cst_20 {dimension_numbers = #tpu.dot_dimension_numbers<[1], [0], [0], [1], [0, 0, 1, 1], [], []>} : vector<16x16xf32>, vector<16x6xf32>, vector<16x6xf32> -> vector<16x6xf32>
    %cst_21 = arith.constant dense<0.000000e+00> : vector<16x6xf32>
    %24 = tpu.matmul %19, %5, %cst_21 {dimension_numbers = #tpu.dot_dimension_numbers<[1], [0], [0], [1], [0, 0, 1, 1], [], []>} : vector<16x16xf32>, vector<16x6xf32>, vector<16x6xf32> -> vector<16x6xf32>
    %cst_22 = arith.constant dense<0.000000e+00> : vector<16x6xf32>
    %25 = tpu.matmul %20, %5, %cst_22 {dimension_numbers = #tpu.dot_dimension_numbers<[1], [0], [0], [1], [0, 0, 1, 1], [], []>} : vector<16x16xf32>, vector<16x6xf32>, vector<16x6xf32> -> vector<16x6xf32>
    %cst_23 = arith.constant dense<0.000000e+00> : vector<16x6xf32>
    %26 = tpu.matmul %21, %5, %cst_23 {dimension_numbers = #tpu.dot_dimension_numbers<[1], [0], [0], [1], [0, 0, 1, 1], [], []>} : vector<16x16xf32>, vector<16x6xf32>, vector<16x6xf32> -> vector<16x6xf32>
    %27 = tpu.concatenate %22, %23, %24, %25, %26 in 1 : vector<16x6xf32>, vector<16x6xf32>, vector<16x6xf32>, vector<16x6xf32>, vector<16x6xf32> -> vector<16x30xf32>
    %cst_24 = arith.constant dense<0.000000e+00> : vector<6x30xf32>
    %28 = tpu.matmul %4, %27, %cst_24 {dimension_numbers = #tpu.dot_dimension_numbers<[1], [0], [0], [1], [0, 0, 1, 1], [], []>} : vector<6x16xf32>, vector<16x30xf32>, vector<6x30xf32> -> vector<6x30xf32>
    %29 = vector.extract_strided_slice %28 {offsets = [0, 0], sizes = [6, 6], strides = [1, 1]} : vector<6x30xf32> to vector<6x6xf32>
    %30 = vector.extract_strided_slice %28 {offsets = [0, 6], sizes = [6, 6], strides = [1, 1]} : vector<6x30xf32> to vector<6x6xf32>
    %31 = vector.extract_strided_slice %28 {offsets = [0, 12], sizes = [6, 6], strides = [1, 1]} : vector<6x30xf32> to vector<6x6xf32>
    %32 = vector.extract_strided_slice %28 {offsets = [0, 18], sizes = [6, 6], strides = [1, 1]} : vector<6x30xf32> to vector<6x6xf32>
    %33 = vector.extract_strided_slice %28 {offsets = [0, 24], sizes = [6, 6], strides = [1, 1]} : vector<6x30xf32> to vector<6x6xf32>
    %34 = arith.mulf %29, %29 : vector<6x6xf32>
    %35 = arith.mulf %30, %30 : vector<6x6xf32>
    %36 = arith.mulf %29, %30 : vector<6x6xf32>
    %37 = arith.subf %31, %34 : vector<6x6xf32>
    %38 = arith.subf %32, %35 : vector<6x6xf32>
    %39 = arith.subf %33, %36 : vector<6x6xf32>
    %cst_25 = arith.constant 2.000000e+00 : f32
    %40 = vector.broadcast %cst_25 : f32 to vector<6x6xf32>
    %41 = arith.mulf %40, %39 : vector<6x6xf32>
    %cst_26 = arith.constant 5.852250e+01 : f32
    %42 = vector.broadcast %cst_26 : f32 to vector<6x6xf32>
    %43 = arith.addf %41, %42 : vector<6x6xf32>
    %44 = arith.addf %37, %38 : vector<6x6xf32>
    %cst_27 = arith.constant 5.852250e+01 : f32
    %45 = vector.broadcast %cst_27 : f32 to vector<6x6xf32>
    %46 = arith.addf %44, %45 : vector<6x6xf32>
    %47 = tpu.reciprocal %46 {approx = true} : vector<6x6xf32> -> vector<6x6xf32>
    %48 = arith.mulf %43, %47 : vector<6x6xf32>
    %cst_28 = arith.constant 2.000000e+00 : f32
    %49 = vector.broadcast %cst_28 : f32 to vector<6x6xf32>
    %50 = arith.mulf %49, %36 : vector<6x6xf32>
    %cst_29 = arith.constant 6.502500e+00 : f32
    %51 = vector.broadcast %cst_29 : f32 to vector<6x6xf32>
    %52 = arith.addf %50, %51 : vector<6x6xf32>
    %53 = arith.addf %34, %35 : vector<6x6xf32>
    %cst_30 = arith.constant 6.502500e+00 : f32
    %54 = vector.broadcast %cst_30 : f32 to vector<6x6xf32>
    %55 = arith.addf %53, %54 : vector<6x6xf32>
    %56 = tpu.reciprocal %55 {approx = true} : vector<6x6xf32> -> vector<6x6xf32>
    %57 = arith.mulf %52, %56 : vector<6x6xf32>
    %58 = arith.mulf %57, %48 : vector<6x6xf32>
    %59 = vector.shape_cast %58 : vector<6x6xf32> to vector<1x6x6xf32>
    %cst_31 = arith.constant dense<0.000000e+00> : vector<1xf32>
    %60 = vector.multi_reduction <add>, %59, %cst_31 [1, 2] : vector<1x6x6xf32> to vector<1xf32>
    %61 = vector.shape_cast %60 : vector<1xf32> to vector<1x1x1xf32>
    %62 = vector.extract %61[0, 0, 0] : f32 from vector<1x1x1xf32>
    %cst_32 = arith.constant 0.027777778 : f32
    %63 = arith.mulf %62, %cst_32 : f32
    %cst_33 = arith.constant 0.000000e+00 : f32
    %64 = arith.maximumf %63, %cst_33 : f32
    %cst_34 = arith.constant 0.000000e+00 : f32
    %65 = arith.addf %cst_34, %64 : f32
    %66 = vector.extract_strided_slice %7 {offsets = [16, 0], sizes = [16, 16], strides = [1, 1]} : vector<32x16xf32> to vector<16x16xf32>
    %67 = vector.extract_strided_slice %8 {offsets = [16, 0], sizes = [16, 16], strides = [1, 1]} : vector<32x16xf32> to vector<16x16xf32>
    %cst_35 = arith.constant dense<0.000000e+00> : vector<16x16xf32>
    %68 = tpu.matmul %0, %67, %cst_35 {dimension_numbers = #tpu.dot_dimension_numbers<[1], [0], [0], [1], [0, 0, 1, 1], [], []>} : vector<16x16xf32>, vector<16x16xf32>, vector<16x16xf32> -> vector<16x16xf32>
    %cst_36 = arith.constant dense<0.000000e+00> : vector<16x16xf32>
    %69 = tpu.matmul %2, %66, %cst_36 {dimension_numbers = #tpu.dot_dimension_numbers<[1], [0], [0], [1], [0, 0, 1, 1], [], []>} : vector<16x16xf32>, vector<16x16xf32>, vector<16x16xf32> -> vector<16x16xf32>
    %70 = vector.extract_strided_slice %9 {offsets = [16, 0], sizes = [16, 16], strides = [1, 1]} : vector<32x16xf32> to vector<16x16xf32>
    %71 = arith.addf %69, %70 : vector<16x16xf32>
    %cst_37 = arith.constant dense<0.000000e+00> : vector<16x16xf32>
    %72 = tpu.matmul %2, %68, %cst_37 {dimension_numbers = #tpu.dot_dimension_numbers<[1], [0], [0], [1], [0, 0, 1, 1], [], []>} : vector<16x16xf32>, vector<16x16xf32>, vector<16x16xf32> -> vector<16x16xf32>
    %cst_38 = arith.constant dense<0.000000e+00> : vector<16x16xf32>
    %73 = tpu.matmul %68, %3, %cst_38 {dimension_numbers = #tpu.dot_dimension_numbers<[1], [0], [0], [1], [0, 0, 1, 1], [], []>} : vector<16x16xf32>, vector<16x16xf32>, vector<16x16xf32> -> vector<16x16xf32>
    %74 = arith.addf %72, %73 : vector<16x16xf32>
    %75 = arith.mulf %71, %71 : vector<16x16xf32>
    %76 = arith.mulf %74, %74 : vector<16x16xf32>
    %77 = arith.mulf %71, %74 : vector<16x16xf32>
    %cst_39 = arith.constant dense<0.000000e+00> : vector<16x6xf32>
    %78 = tpu.matmul %71, %5, %cst_39 {dimension_numbers = #tpu.dot_dimension_numbers<[1], [0], [0], [1], [0, 0, 1, 1], [], []>} : vector<16x16xf32>, vector<16x6xf32>, vector<16x6xf32> -> vector<16x6xf32>
    %cst_40 = arith.constant dense<0.000000e+00> : vector<16x6xf32>
    %79 = tpu.matmul %74, %5, %cst_40 {dimension_numbers = #tpu.dot_dimension_numbers<[1], [0], [0], [1], [0, 0, 1, 1], [], []>} : vector<16x16xf32>, vector<16x6xf32>, vector<16x6xf32> -> vector<16x6xf32>
    %cst_41 = arith.constant dense<0.000000e+00> : vector<16x6xf32>
    %80 = tpu.matmul %75, %5, %cst_41 {dimension_numbers = #tpu.dot_dimension_numbers<[1], [0], [0], [1], [0, 0, 1, 1], [], []>} : vector<16x16xf32>, vector<16x6xf32>, vector<16x6xf32> -> vector<16x6xf32>
    %cst_42 = arith.constant dense<0.000000e+00> : vector<16x6xf32>
    %81 = tpu.matmul %76, %5, %cst_42 {dimension_numbers = #tpu.dot_dimension_numbers<[1], [0], [0], [1], [0, 0, 1, 1], [], []>} : vector<16x16xf32>, vector<16x6xf32>, vector<16x6xf32> -> vector<16x6xf32>
    %cst_43 = arith.constant dense<0.000000e+00> : vector<16x6xf32>
    %82 = tpu.matmul %77, %5, %cst_43 {dimension_numbers = #tpu.dot_dimension_numbers<[1], [0], [0], [1], [0, 0, 1, 1], [], []>} : vector<16x16xf32>, vector<16x6xf32>, vector<16x6xf32> -> vector<16x6xf32>
    %83 = tpu.concatenate %78, %79, %80, %81, %82 in 1 : vector<16x6xf32>, vector<16x6xf32>, vector<16x6xf32>, vector<16x6xf32>, vector<16x6xf32> -> vector<16x30xf32>
    %cst_44 = arith.constant dense<0.000000e+00> : vector<6x30xf32>
    %84 = tpu.matmul %4, %83, %cst_44 {dimension_numbers = #tpu.dot_dimension_numbers<[1], [0], [0], [1], [0, 0, 1, 1], [], []>} : vector<6x16xf32>, vector<16x30xf32>, vector<6x30xf32> -> vector<6x30xf32>
    %85 = vector.extract_strided_slice %84 {offsets = [0, 0], sizes = [6, 6], strides = [1, 1]} : vector<6x30xf32> to vector<6x6xf32>
    %86 = vector.extract_strided_slice %84 {offsets = [0, 6], sizes = [6, 6], strides = [1, 1]} : vector<6x30xf32> to vector<6x6xf32>
    %87 = vector.extract_strided_slice %84 {offsets = [0, 12], sizes = [6, 6], strides = [1, 1]} : vector<6x30xf32> to vector<6x6xf32>
    %88 = vector.extract_strided_slice %84 {offsets = [0, 18], sizes = [6, 6], strides = [1, 1]} : vector<6x30xf32> to vector<6x6xf32>
    %89 = vector.extract_strided_slice %84 {offsets = [0, 24], sizes = [6, 6], strides = [1, 1]} : vector<6x30xf32> to vector<6x6xf32>
    %90 = arith.mulf %85, %85 : vector<6x6xf32>
    %91 = arith.mulf %86, %86 : vector<6x6xf32>
    %92 = arith.mulf %85, %86 : vector<6x6xf32>
    %93 = arith.subf %87, %90 : vector<6x6xf32>
    %94 = arith.subf %88, %91 : vector<6x6xf32>
    %95 = arith.subf %89, %92 : vector<6x6xf32>
    %cst_45 = arith.constant 2.000000e+00 : f32
    %96 = vector.broadcast %cst_45 : f32 to vector<6x6xf32>
    %97 = arith.mulf %96, %95 : vector<6x6xf32>
    %cst_46 = arith.constant 5.852250e+01 : f32
    %98 = vector.broadcast %cst_46 : f32 to vector<6x6xf32>
    %99 = arith.addf %97, %98 : vector<6x6xf32>
    %100 = arith.addf %93, %94 : vector<6x6xf32>
    %cst_47 = arith.constant 5.852250e+01 : f32
    %101 = vector.broadcast %cst_47 : f32 to vector<6x6xf32>
    %102 = arith.addf %100, %101 : vector<6x6xf32>
    %103 = tpu.reciprocal %102 {approx = true} : vector<6x6xf32> -> vector<6x6xf32>
    %104 = arith.mulf %99, %103 : vector<6x6xf32>
    %cst_48 = arith.constant 2.000000e+00 : f32
    %105 = vector.broadcast %cst_48 : f32 to vector<6x6xf32>
    %106 = arith.mulf %105, %92 : vector<6x6xf32>
    %cst_49 = arith.constant 6.502500e+00 : f32
    %107 = vector.broadcast %cst_49 : f32 to vector<6x6xf32>
    %108 = arith.addf %106, %107 : vector<6x6xf32>
    %109 = arith.addf %90, %91 : vector<6x6xf32>
    %cst_50 = arith.constant 6.502500e+00 : f32
    %110 = vector.broadcast %cst_50 : f32 to vector<6x6xf32>
    %111 = arith.addf %109, %110 : vector<6x6xf32>
    %112 = tpu.reciprocal %111 {approx = true} : vector<6x6xf32> -> vector<6x6xf32>
    %113 = arith.mulf %108, %112 : vector<6x6xf32>
    %114 = arith.mulf %113, %104 : vector<6x6xf32>
    %115 = vector.shape_cast %114 : vector<6x6xf32> to vector<1x6x6xf32>
    %cst_51 = arith.constant dense<0.000000e+00> : vector<1xf32>
    %116 = vector.multi_reduction <add>, %115, %cst_51 [1, 2] : vector<1x6x6xf32> to vector<1xf32>
    %117 = vector.shape_cast %116 : vector<1xf32> to vector<1x1x1xf32>
    %118 = vector.extract %117[0, 0, 0] : f32 from vector<1x1x1xf32>
    %cst_52 = arith.constant 0.027777778 : f32
    %119 = arith.mulf %118, %cst_52 : f32
    %cst_53 = arith.constant 0.000000e+00 : f32
    %120 = arith.maximumf %119, %cst_53 : f32
    %121 = arith.addf %65, %120 : f32
    %122 = vector.broadcast %121 : f32 to vector<1x1x128xf32>
    %c0_54 = arith.constant 0 : index
    %c0_55 = arith.constant 0 : index
    %c0_56 = arith.constant 0 : index
    %123 = vector.load %arg8[%c0_54, %c0_55, %c0_56] : memref<1x1x128xf32, #tpu.memory_space<vmem>>, vector<1x1x128xf32>
    tpu.vector_store %arg8[%c0_54, %c0_55, %c0_56], %122 {strides = array<i32>} : memref<1x1x128xf32, #tpu.memory_space<vmem>>, vector<1x1x128xf32>,
    return
  }
  func.func @transform_0(%arg0: i32) -> (i32, i32, i32) {
    %c0_i32 = arith.constant 0 : i32
    %c0_i32_0 = arith.constant 0 : i32
    %c0_i32_1 = arith.constant 0 : i32
    return %arg0, %c0_i32, %c0_i32_0 : i32, i32, i32
  }
  func.func @transform_1(%arg0: i32) -> (i32, i32) {
    %c0_i32 = arith.constant 0 : i32
    %c0_i32_0 = arith.constant 0 : i32
    %c0_i32_1 = arith.constant 0 : i32
    return %c0_i32, %c0_i32_0 : i32, i32
  }
  func.func @transform_2(%arg0: i32) -> (i32, i32) {
    %c0_i32 = arith.constant 0 : i32
    %c0_i32_0 = arith.constant 0 : i32
    %c0_i32_1 = arith.constant 0 : i32
    return %c0_i32, %c0_i32_0 : i32, i32
  }
  func.func @transform_3(%arg0: i32) -> (i32, i32) {
    %c0_i32 = arith.constant 0 : i32
    %c0_i32_0 = arith.constant 0 : i32
    %c0_i32_1 = arith.constant 0 : i32
    return %c0_i32, %c0_i32_0 : i32, i32
  }
  func.func @transform_4(%arg0: i32) -> (i32, i32) {
    %c0_i32 = arith.constant 0 : i32
    %c0_i32_0 = arith.constant 0 : i32
    %c0_i32_1 = arith.constant 0 : i32
    return %c0_i32, %c0_i32_0 : i32, i32
  }
  func.func @transform_5(%arg0: i32) -> (i32, i32) {
    %c0_i32 = arith.constant 0 : i32
    %c0_i32_0 = arith.constant 0 : i32
    %c0_i32_1 = arith.constant 0 : i32
    return %c0_i32, %c0_i32_0 : i32, i32
  }
  func.func @transform_6(%arg0: i32) -> (i32, i32) {
    %c0_i32 = arith.constant 0 : i32
    %c0_i32_0 = arith.constant 0 : i32
    %c0_i32_1 = arith.constant 0 : i32
    return %c0_i32, %c0_i32_0 : i32, i32
  }
  func.func @transform_7(%arg0: i32) -> (i32, i32, i32) {
    %c0_i32 = arith.constant 0 : i32
    %c0_i32_0 = arith.constant 0 : i32
    %c0_i32_1 = arith.constant 0 : i32
    return %arg0, %c0_i32, %c0_i32_0 : i32, i32, i32
  }
}

</mosaic_0001>

<bundles_post_ra>
// kernel: tpu_custom_call.1
= control target key start
LH: loop header
LB: loop body
LE: loop exit
PB: predicated region body
PF: predicated region fallthrough
CT: control target
= control target key end

     0   :  { %12 = vsyncpa [#allocation3], 0  ;;  %s3685_s0 = inlined_call_operand.hbm [shape: f32[4,16,16], index: 0, kind: input, shape index: {}]   ;;  %s3686_s1 = inlined_call_operand.vmem [shape: f32[16,16], index: 1, kind: input, shape index: {}]   ;;  %s3687_s2 = inlined_call_operand.hbm [shape: f32[16,16], index: 2, kind: input, shape index: {}]   ;;  %s3688_s3 = inlined_call_operand.vmem [shape: f32[16,16], index: 3, kind: input, shape index: {}]   ;;  %s3689_s4 = inlined_call_operand.hbm [shape: f32[16,16], index: 4, kind: input, shape index: {}]   ;;  %s3690_s5 = inlined_call_operand.hbm [shape: f32[6,16], index: 5, kind: input, shape index: {}]   ;;  %s3691_s6 = inlined_call_operand.vmem [shape: f32[16,6], index: 6, kind: input, shape index: {}]   ;;  %s3692_s7 = inlined_call_operand.hbm [shape: f32[2,1,128], index: 7, kind: output, shape index: {}]  }
   0x1   :  { %14 = vsyncpa [#allocation3 + $0x1], 0 }
   0x2   :  { %15 = vsyncpa [#allocation6], 0 }
   0x3   :  { %16 = vsyncpa [#allocation9], 0 }
   0x4   :  { %17 = vsyncpa [#allocation4], 0 }
   0x5   :  { %19 = vsyncpa [#allocation4 + $0x1], 0  ;;  %s3234_s24 = smov 0   ;;  %s3236_s25 = smov 0  }
   0x6   :  { %s3238_s26 = smov 0   ;;  %s3240_s27 = smov 0  }
   0x7 LB: > { %s3255_s28 = sadd.s32 4294967295, %s3175_s27   ;;  %s2436_s29 = sadd.s32 4294967294, %s3175_s27   ;;  %s3175_s27 = sphi %s3240_s27, %s3718_s27   ;;  %s3171_s26 = sphi %s3238_s26, %s3717_s26   ;;  %s3167_s25 = sphi %s3236_s25, %s3716_s25   ;;  %s3163_s24 = sphi %s3234_s24, %s3715_s24  }
   0x8   : > { %p45_p0 = scmp.ne.s32.totalorder %s3167_s25, %s3163_s24  ;;  %p3693_p1 = scmp.eq.s32.totalorder %s3255_s28, 0 }
   0x9   : > { %p201_p3 = scmp.eq.s32.totalorder %s2436_s29, 1  ;;  %p2437_p5 = scmp.ge.s32.totalorder %s3175_s27, 1 }
   0xa   : > { %p3264_p4 = por %p3693_p1, %p45_p0  ;;  %p208_p7 = scmp.lt.s32.totalorder %s3175_s27, 3 }
   0xb   : > { %p3269_p6 = por %p201_p3, %p45_p0  ;;  %s3177_s10 = smov [#allocation5]  }
   0xc   : > { %s3697_s30 = scalar_select %p3264_p4, 1, 0 }
   0xd   : > { %s3698_s8 = scalar_select %p3269_p6, 1, 0 }
   0xe   : > { %p3274_p8 = pnand %p2437_p5, %p208_p7  ;;  %s223_s11 = sshll.u32 %s3177_s10, 4  ;;  %s3278_s11 = int_to_ptr.vmem [resolvable:$true] %s223_s11 }
   0xf   : > { %3699 = sst [smem:[#allocation15_spill]] %s3698_s8  ;;  %s3178_s13 = smov [#allocation7]  }
  0x10   : > { %s3700_s9 = scalar_select %p3274_p8, 1, 0 }
  0x11   : > { %p2866_p9 = pneg %p3274_p8  ;;  %s239_s14 = sshll.u32 %s3178_s13, 4  ;;  %s3289_s14 = int_to_ptr.vmem [resolvable:$true] %s239_s14 }
  0x12   : > { %s3179_s15 = smov [#allocation8]   ;;  %s2987_s19 = scalar_lea.hbm %s3687_s2, 256 }
  0x13   : > { %p3285_p11 = pnand %p2866_p9, %p3693_p1  ;;  %s3291_s16 = sshll.u32 %s3179_s15, 4  ;;  %s254_s16 = int_to_ptr.vmem [resolvable:$true] %s3291_s16 }
  0x14   : > { %p2988_p12 = scmp.ne.s32.totalorder %s3687_s2, %s2987_s19  ;;  %p2994_p5 = scmp.lt.u32.totalorder %s2987_s19, %s3687_s2 }
  0x15   : > { %p3301_p13 = pneg %p3285_p11 }
  0x17   : > { %p2990_p0 = pnand %p3301_p13, %p2988_p12 }
  0x19   : > { %p2991_p3 = pneg %p2990_p0 }
  0x1b   : > { %p2996_p7 = pnand %p2994_p5, %p2991_p3 }
  0x1d   : > { %2999 = shalt.err (!%p2996_p7)
}
  0x1e   : > { %s3000_s10 = scalar_lea.vmem %s3278_s11, 256  ;;  %p3008_p2 = scmp.lt.s32.totalorder %s3278_s11, %s3278_s11 }
  0x1f   : > { %p3001_p9 = scmp.ne.s32.totalorder %s3278_s11, %s3000_s10  ;;  %p3009_p6 = scmp.lt.s32.totalorder %s3000_s10, %s3000_s10 }
  0x21   : > { %p3003_p10 = pnand %p3001_p9, %p3301_p13  ;;  %p3010_p12 = por %p3009_p6, %p3008_p2 }
  0x23   : > { %p3004_p1 = pneg %p3003_p10 }
  0x25   : > { %p3011_p0 = pnand %p3010_p12, %p3004_p1 }
  0x27   : > { %3014 = shalt.err (!%p3011_p0)
}
  0x28   : > { %s3180_s13 = smov 128   ;;  %s3181_s15 = smov 8  }
  0x29   : > { %2869 = dma.hbm_to_vmem [thread:$0]  (!%p3285_p11), %s3687_s2, 256, %s3278_s11, [#allocation6], %s3180_s13, %s3180_s13, %s3181_s15  }
  0x2a   : > { %s3015_s21 = scalar_lea.hbm %s3689_s4, 256 }
  0x2b   : > { %p3016_p1 = scmp.ne.s32.totalorder %s3689_s4, %s3015_s21  ;;  %p3022_p10 = scmp.lt.u32.totalorder %s3015_s21, %s3689_s4 }
  0x2d   : > { %p3018_p2 = pnand %p3016_p1, %p3301_p13 }
  0x2f   : > { %p3019_p6 = pneg %p3018_p2 }
  0x31   : > { %p3024_p3 = pnand %p3022_p10, %p3019_p6 }
  0x33   : > { %3027 = shalt.err (!%p3024_p3)
}
  0x34   : > { %s3028_s11 = scalar_lea.vmem %s3289_s14, 256  ;;  %p3036_p12 = scmp.lt.s32.totalorder %s3289_s14, %s3289_s14 }
  0x35   : > { %p3029_p5 = scmp.ne.s32.totalorder %s3289_s14, %s3028_s11  ;;  %p3037_p0 = scmp.lt.s32.totalorder %s3028_s11, %s3028_s11 }
  0x37   : > { %p3031_p7 = pnand %p3029_p5, %p3301_p13  ;;  %p3038_p1 = por %p3037_p0, %p3036_p12 }
  0x39   : > { %p3032_p9 = pneg %p3031_p7 }
  0x3b   : > { %p3039_p2 = pnand %p3038_p1, %p3032_p9 }
  0x3d   : > { %3042 = shalt.err (!%p3039_p2)
}
  0x3e   : > { %2872 = dma.hbm_to_vmem [thread:$0]  (!%p3285_p11), %s3689_s4, 256, %s3289_s14, [#allocation6], %s3180_s13, %s3180_s13, %s3181_s15  }
  0x3f   : > { %s3043_s20 = scalar_lea.hbm %s3690_s5, 128 }
  0x40   : > { %p3044_p6 = scmp.ne.s32.totalorder %s3690_s5, %s3043_s20  ;;  %p3050_p5 = scmp.lt.u32.totalorder %s3043_s20, %s3690_s5 }
  0x42   : > { %p3046_p10 = pnand %p3044_p6, %p3301_p13 }
  0x44   : > { %p3047_p3 = pneg %p3046_p10 }
  0x46   : > { %p3052_p7 = pnand %p3050_p5, %p3047_p3 }
  0x48   : > { %3055 = shalt.err (!%p3052_p7)
}
  0x49   : > { %s3056_s11 = scalar_lea.vmem %s254_s16, 128  ;;  %p3064_p1 = scmp.lt.s32.totalorder %s254_s16, %s254_s16 }
  0x4a   : > { %p3057_p9 = scmp.ne.s32.totalorder %s254_s16, %s3056_s11  ;;  %p3065_p2 = scmp.lt.s32.totalorder %s3056_s11, %s3056_s11 }
  0x4c   : > { %p3059_p12 = pnand %p3057_p9, %p3301_p13  ;;  %p3066_p4 = por %p3065_p2, %p3064_p1 }
  0x4e   : > { %p3060_p0 = pneg %p3059_p12 }
  0x50   : > { %p3067_p8 = pnand %p3066_p4, %p3060_p0 }
  0x52   : > { %3070 = shalt.err (!%p3067_p8)
}
  0x53   : > { %2875 = dma.hbm_to_vmem [thread:$0]  (!%p3285_p11), %s3690_s5, 128, %s254_s16, [#allocation9]  }
  0x54   : > { %s3371_s22 = sadd.s32 1, %s3175_s27   ;;  %s32_s12 = sadd.s32 1, %s3171_s26 }
  0x55   : > { %s29_s17 = ssub.s32 %s3175_s27, %s3371_s22  ;;  %p39_p8 = scmp.ne.s32.totalorder %s3171_s26, %s3167_s25 }
  0x56   : > { %p30_p4 = scmp.eq.s32.totalorder %s29_s17, 0  ;;  %p40_p13 = scmp.eq.s32.totalorder %s3175_s27, 0 }
  0x57   : > { %p2887_p6 = scmp.lt.s32.totalorder %s3175_s27, 2  ;;  %p3703_p3 = scmp.eq.s32.totalorder %s3255_s28, 1 }
  0x58   : > { %s3381_s18 = scalar_select %p30_p4, %s3171_s26, %s32_s12  }
  0x59   : > { %p41_p10 = por %p40_p13, %p39_p8  ;;  %p3385_p5 = por %p3703_p3, %p39_p8 }
  0x5a   : > { %s267_s20 = sand.u32 1, %s3171_s26   ;;  %s2501_s21 = sshll.u32 %s3175_s27, 9 }
  0x5b   : > { %s2442_s16 = sshll.u32 %s267_s20, 5  ;;  %s3394_s10 = scalar_lea.hbm %s3685_s0, %s2501_s21 }
  0x5c   : > { %s271_s11 = scalar_lea.vmem [#allocation2], %s2442_s16  ;;  %p3396_p11 = pnand %p2887_p6, %p41_p10 }
  0x5d   : > { %s279_s14 = sshll.u32 %s271_s11, 4  ;;  %s3402_s17 = scalar_lea.sflag [#allocation3], %s267_s20  ;;  %s3400_s14 = int_to_ptr.vmem [resolvable:$true] %s279_s14 }
  0x5e   : > { %s3071_s12 = scalar_lea.hbm %s3394_s10, 512  ;;  %p3073_p9 = pneg %p3396_p11 }
  0x5f   : > { %p3072_p7 = scmp.ne.s32.totalorder %s3394_s10, %s3071_s12  ;;  %s3076_s23 = scalar_lea.hbm %s3685_s0, 1024 }
  0x60   : > { %p3077_p1 = scmp.lt.u32.totalorder %s3394_s10, %s3685_s0  ;;  %p3078_p2 = scmp.lt.u32.totalorder %s3076_s23, %s3071_s12 }
  0x61   : > { %p3074_p12 = pnand %p3073_p9, %p3072_p7  ;;  %p3080_p8 = scmp.lt.u32.totalorder %s3071_s12, %s3394_s10 }
  0x62   : > { %p3079_p4 = por %p3078_p2, %p3077_p1 }
  0x63   : > { %p3075_p0 = pneg %p3074_p12 }
  0x64   : > { %p3081_p13 = por %p3080_p8, %p3079_p4 }
  0x66   : > { %p3082_p6 = pnand %p3081_p13, %p3075_p0 }
  0x68   : > { %3085 = shalt.err (!%p3082_p6)
}
  0x69   : > { %s3086_s20 = scalar_lea.vmem %s3400_s14, 512  ;;  %s3182_s21 = smov [#allocation2]  }
  0x6a   : > { %p3087_p10 = scmp.ne.s32.totalorder %s3400_s14, %s3086_s20  ;;  %s3091_s16 = sshll.u32 %s3182_s21, 4  ;;  %s3092_s16 = int_to_ptr.vmem [resolvable:$false] %s3091_s16 }
  0x6b   : > { %s3093_s29 = scalar_lea.vmem %s3092_s16, 1024  ;;  %p3094_p12 = scmp.lt.s32.totalorder %s3400_s14, %s3092_s16 }
  0x6c   : > { %p3089_p3 = pnand %p3087_p10, %p3073_p9  ;;  %p3095_p1 = scmp.lt.s32.totalorder %s3093_s29, %s3086_s20 }
  0x6e   : > { %p3090_p7 = pneg %p3089_p3  ;;  %p3096_p2 = por %p3095_p1, %p3094_p12 }
  0x70   : > { %p3097_p4 = pnand %p3096_p2, %p3090_p7 }
  0x72   : > { %3100 = shalt.err (!%p3097_p4)
}
  0x73   : > { %2879 = dma.hbm_to_vmem [thread:$0]  (!%p3396_p11), %s3394_s10, 512, %s3400_s14, %s3402_s17, %s3180_s13, %s3180_s13, %s3181_s15  }
  0x74   : > { %p3706_p9 = scmp.ne.s32.totalorder %s3700_s9, 0 }
  0x75   : > { %s3436_s12 = sand.u32 (!%p3706_p9), 1, %s3167_s25   ;;  %p3707_p0 = scmp.ne.s32.totalorder (!%p3706_p9), %s3697_s30, 0 }
  0x76   : > { %291 = sbr.rel (%p3706_p9) target bundleno = 2628 (0xa44), region = 48  ;;  %s2447_s23 = sshll.u32 (!%p3706_p9), %s3436_s12, 5 }
  0x77   : > { %s294_s11 = scalar_lea.sflag (!%p3706_p9), [#allocation3], %s3436_s12  ;;  %s297_s20 = scalar_lea.vmem (!%p3706_p9), [#allocation2], %s2447_s23 }
  0x7d   : > { %3146 = dma.done.wait (%p3707_p0), %s294_s11, 512  }
  0x7e   : > { %3148 = vsyncadd (%p3707_p0), %s294_s11, 4294966784  ;;  %p3708_p8 = scmp.eq.s32.totalorder %s3255_s28, 0 }
  0x80   : > { %3150 = dma.done.wait (%p3708_p8), [#allocation6], 512   ;;  %p3709_p11 = pmov %p3708_p8 }
  0x81   : > { %p3710_p13 = pmov %p3708_p8 }
  0x82   : > { %3152 = vsyncadd (%p3709_p11), [#allocation6], 4294966784 }
  0x83   : > { %3154 = dma.done.wait (%p3710_p13), [#allocation9], 128   ;;  %p3711_p6 = pmov %p3708_p8 }
  0x84   : > { %vm355_vm0 = vcmask 130048   ;;  %v342_v0 = vld [vmem:[#allocation5] sm:$0xff]  ;;  %v343_v1 = vld [vmem:[#allocation5 + $0x8] sm:$0xff]  ;;  %v3455_v5 = vld [vmem:[%s297_s20 + $0x10] sm:$0xff]  ;;  %v3183_v46 = vmov 0.0|0.0   ;;  %s3184_s11 = smov 6  }
  0x85   : > { %3156 = vsyncadd (%p3711_p6), [#allocation9], 4294967168  ;;  %v351_v2 = vld [vmem:[%s297_s20] sm:$0xff]  ;;  %v2752_v3 = vpack.c.bf16 %v343_v1, %v342_v0  ;;  %v352_v4 = vld [vmem:[%s297_s20 + $0x8] sm:$0xff]  ;;  %vm3185_vm1 = vmmov 0   ;;  %v3186_v51 = vmov 0.0  }
  0x86   : > { %2596 = vmatprep.mubr.msk.f32.mxu0 %vm355_vm0, %v351_v2  ;;  %2606 = vmatprep.mubr.msk.f32.mxu1 %vm355_vm0, %v351_v2  ;;  %v3459_v6 = vld [vmem:[%s297_s20 + $0x18] sm:$0xff]  ;;  %v346_v7 = vld [vmem:[#allocation7] sm:$0xff]  ;;  %v3468_v10 = vld [vmem:[%s3686_s1] sm:$0xff]  ;;  %v2764_v11 = vpack.c.bf16 %v352_v4, %v351_v2  ;;  %s3187_s20 = smov 12   ;;  %s3188_s30 = smov 18   ;;  %vm1299_vm2 = vcmask 48128  }
  0x87   : > { %2753 = vmatprep.subr.bf16.mxu0 %v2752_v3  ;;  %v347_v8 = vld [vmem:[#allocation7 + $0x8] sm:$0xff]  ;;  %v3480_v12 = vld [vmem:[%s3688_s3] sm:$0xff]  ;;  %v3489_v13 = vld [vmem:[%s3688_s3 + $0x8] sm:$0xff]  ;;  %s3189_s9 = smov 24   ;;  %vm1302_vm3 = vcmask 97280   ;;  %vm1305_vm4 = vcmask 146432  }
  0x88   : > { %2755 = vmatpush3.bf16.msra.mxu0 %v2752_v3  ;;  %v3463_v9 = vpack.c.bf16 %v347_v8, %v346_v7  ;;  %v341_v17 = vld [vmem:[%s3686_s1 + $0x8] sm:$0xff]  ;;  %v349_v21 = vld [vmem:[%s3691_s6] sm:$0xff]  ;;  %vm1308_vm5 = vcmask 195584   ;;  %s3190_s13 = smov 122   ;;  %s3191_s15 = smov 104   ;;  %vm1428_vm6 = vcmask 46080  }
  0x89   : > { %v350_v22 = vld [vmem:[%s3691_s6 + $0x8] sm:$0xff]  ;;  %s2497_s21 = sshll.u32 %s3255_s28, 4  ;;  %s338_s16 = scalar_lea.vmem [#allocation10], %s3436_s12 }
  0x8a   : > { %2757 = vmatprep.subr.bf16.mxu1 %v3463_v9  ;;  %v3505_v23 = vpack.c.bf16 %v350_v22, %v349_v21  ;;  %s2341_s29 = sshll.u32 %s338_s16, 4  ;;  %s3192_s23 = smov 0.0   ;;  %s3643_s29 = int_to_ptr.vmem [resolvable:$true] %s2341_s29 }
  0x8b   : > { %2597 = vmatmul.mubr.msk.f32.vlgmr.msra.gmra.mrb[0].mxu0 %vm355_vm0, %v352_v4  ;;  %2759 = vmatpush3.bf16.msra.mxu1 %v3463_v9  ;;  %s3101_s28 = scalar_lea.vmem %s3643_s29, 16 }
  0x8c   : > { %2599 = vmatprep.mubr.msk.f32.mxu0 %vm355_vm0, %v3455_v5  ;;  %2765 = vmatprep.subr.bf16.mxu1 %v2764_v11  ;;  %p3102_p10 = scmp.ne.s32.totalorder %s3643_s29, %s3101_s28 }
  0x8e   : > { %2607 = vmatmul.mubr.msk.f32.vlgmr.msra.gmra.mrb[0].mxu1 %vm355_vm0, %v352_v4  ;;  %p3103_p3 = pnand %p3102_p10, %p3385_p5 }
  0x8f   : > { %2600 = vmatmul.mubr.msk.f32.gmra.mrb[2].mxu0 %vm355_vm0, %v3459_v6  ;;  %2609 = vmatprep.mubr.msk.f32.mxu1 %vm355_vm0, %v3455_v5 }
  0x90   : > { %2616 = vmatprep.mubr.msk.f32.mxu0 %vm355_vm0, %v3468_v10  ;;  %2767 = vmatpush3.bf16.msra.mxu1 %v2764_v11  ;;  %p3104_p7 = pneg %p3103_p3 }
  0x91   : > { %2777 = vmatprep.subr.bf16.mxu1 %v3505_v23 }
  0x92   : > { %2610 = vmatmul.mubr.msk.f32.gmra.mrb[2].mxu1 %vm355_vm0, %v3459_v6 }
  0x93   : > { %2623 = vmatprep.mubr.msk.f32.mxu1 %vm355_vm0, %v3480_v12 }
  0x96   : > { %2624 = vmatmul.mubr.msk.f32.vlgmr.msra.gmra.mrb[0].mxu1 %vm355_vm0, %v3489_v13 }
  0x97   : > { %2779 = vmatpush3.bf16.msra.mxu1 %v3505_v23 }
  0x98   : > { %2781 = vmatprep.subr.bf16.mxu1 %v3505_v23 }
 0x15e   : > { %v2598_v14 = vpop.f32.mrb[0].mxu0 }
 0x15f   : > { %v434_v15 = vpop.f32.mrb[1].mxu0 }
 0x160   : > { %v2760_v16 = vpack.c.bf16 %v2598_v14, %v434_v15 }
 0x162   : > { %2761 = vmatprep.subr.bf16.mxu0 %v2760_v16  ;;  %v2601_v18 = vpop.f32.mrb[2].mxu0 }
 0x163   : > { %2763 = vmatpush3.bf16.msra.mxu0 %v2760_v16  ;;  %v444_v19 = vpop.f32.mrb[3].mxu0  ;;  %v2803_v16 = vpack.c.bf16 %v3459_v6, %v3455_v5 }
 0x164   : > { %2769 = vmatprep.subr.bf16.mxu0 %v3463_v9  ;;  %v2799_v20 = vpack.c.bf16 %v2601_v18, %v444_v19  ;;  %v3570_v18 = vld [vmem:[#allocation8] sm:$0x3f] }
 0x166   : > { %2617 = vmatmul.mubr.msk.f32.vlgmr.msra.gmra.mrb[4].mxu0 %vm355_vm0, %v341_v17 }
 0x167   : > { %2771 = vmatpush3.bf16.msra.mxu0 %v3463_v9 }
 0x169   : > { %v2625_v24 = vpop.f32.mrb[0].mxu1 }
 0x16a   : > { %v691_v25 = vpop.f32.mrb[1].mxu1  ;;  %v857_v30 = vmul.f32 %v2625_v24, %v2625_v24 }
 0x16b   : > { %2644 = vmatprep.mubr.msk.f32.mxu1 %vm355_vm0, %v691_v25  ;;  %v856_v29 = vmul.f32 %v691_v25, %v691_v25 }
 0x16c   : > { %2645 = vmatmul.mubr.msk.f32.vlgmr.msra.gmra.mrb[4].mxu1 %vm355_vm0, %v2625_v24 }
 0x16d   : > { %2783 = vmatpush3.bf16.msra.mxu1 %v3505_v23 }
 0x16e   : > { %2789 = vmatprep.subr.bf16.mxu1 %v3505_v23 }
 0x239   : > { %v2618_v26 = vpop.f32.mrb[4].mxu0 }
 0x23a   : > { %v610_v27 = vpop.f32.mrb[5].mxu0 }
 0x23b   : > { %v2772_v28 = vpack.c.bf16 %v2618_v26, %v610_v27  ;;  %2630 = vmatprep.mubr.msk.f32.mxu0 %vm355_vm0, %v610_v27 }
 0x23c   : > { %2631 = vmatmul.mubr.msk.f32.vlgmr.msra.gmra.mrb[6].mxu0 %vm355_vm0, %v2618_v26 }
 0x23d   : > { %2773 = vmatprep.subr.bf16.mxu0 %v2772_v28  ;;  %2637 = vmatprep.mubr.msk.f32.mxu0 %vm355_vm0, %v3480_v12 }
 0x23e   : > { %2775 = vmatpush3.bf16.msra.mxu0 %v2772_v28 }
 0x23f   : > { %2785 = vmatprep.subr.bf16.mxu0 %v3505_v23  ;;  %v3526_v31 = vpop.f32.mrb[4].mxu1 }
 0x240   : > { %v3528_v32 = vpop.f32.mrb[5].mxu1 }
 0x244   : > { %2638 = vmatmul.mubr.msk.f32.vlgmr.msra.gmra.mrb[6].mxu0 %vm355_vm0, %v3489_v13 }
 0x245   : > { %2787 = vmatpush3.bf16.msra.mxu0 %v3505_v23  ;;  %2658 = vmatprep.mubr.msk.f32.mxu0 %vm355_vm0, %v856_v29 }
 0x246   : > { %2793 = vmatprep.subr.bf16.mxu0 %v3505_v23 }
 0x248   : > { %2659 = vmatmul.mubr.msk.f32.vlgmr.msra.gmra.mrb[8].mxu0 %vm355_vm0, %v857_v30 }
 0x249   : > { %2795 = vmatpush3.bf16.msra.mxu0 %v3505_v23 }
 0x24a   : > { %2800 = vmatprep.subr.bf16.mxu0 %v2799_v20 }
 0x317   : > { %v2639_v33 = vpop.f32.mrb[6].mxu0 }
 0x318   : > { %v861_v34 = vmul.f32 %v2639_v33, %v2625_v24  ;;  %v847_v35 = vpop.f32.mrb[7].mxu0  ;;  %v859_v39 = vmul.f32 %v2639_v33, %v2639_v33 }
 0x319   : > { %v858_v36 = vmul.f32 %v847_v35, %v847_v35  ;;  %v860_v37 = vmul.f32 %v847_v35, %v691_v25  ;;  %2651 = vmatprep.mubr.msk.f32.mxu1 %vm355_vm0, %v847_v35 }
 0x31a   : > { %2652 = vmatmul.mubr.msk.f32.vlgmr.msra.gmra.mrb[6].mxu1 %vm355_vm0, %v2639_v33 }
 0x31b   : > { %2791 = vmatpush3.bf16.msra.mxu1 %v3505_v23  ;;  %2665 = vmatprep.mubr.msk.f32.mxu1 %vm355_vm0, %v858_v36  ;;  %v2660_v38 = vpop.f32.mrb[8].mxu0 }
 0x31c   : > { %2672 = vmatprep.mubr.msk.f32.mxu0 %vm355_vm0, %v860_v37  ;;  %v1096_v40 = vpop.f32.mrb[9].mxu0  ;;  %2796 = vmatprep.subr.bf16.mxu1 %v3183_v46 }
 0x31d   : > { %2673 = vmatmul.mubr.msk.f32.vlgmr.msra.gmra.mrb[10].mxu0 %vm355_vm0, %v861_v34  ;;  %v2944_v41 = vpack.i.bf16 %v2660_v38, %v1096_v40 }
 0x31e   : > { %2802 = vmatpush3.bf16.msra.mxu0 %v2799_v20  ;;  %2666 = vmatmul.mubr.msk.f32.vlgmr.msra.gmra.mrb[8].mxu1 %vm355_vm0, %v859_v39 }
 0x31f   : > { %2686 = vmatprep.mubr.msk.f32.mxu0 %vm355_vm0, %v3468_v10  ;;  %2808 = vmatprep.subr.bf16.mxu0 %v3463_v9 }
 0x320   : > { %2679 = vmatprep.mubr.msk.f32.mxu1 %vm3185_vm1, %v3186_v51 }
 0x321   : > { %2687 = vmatmul.mubr.msk.f32.vlgmr.msra.gmra.mrb[12].mxu0 %vm355_vm0, %v341_v17 }
 0x322   : > { %2810 = vmatpush3.bf16.msra.mxu0 %v3463_v9 }
 0x3ed   : > { %v2653_v42 = vpop.f32.mrb[6].mxu1 }
 0x3ee   : > { %v1015_v43 = vpop.f32.mrb[7].mxu1 }
 0x3ef   : > { %v2939_v44 = vpack.i.bf16 %v2653_v42, %v1015_v43 }
 0x3f0   : > { %v2674_v45 = vpop.f32.mrb[10].mxu0 }
 0x3f1   : > { %v1258_v47 = vpop.f32.mrb[11].mxu0  ;;  %2940 = vrot.lane.b32.xlu0 %v2939_v44, %s3184_s11  ;;  %v2667_v48 = vpop.f32.mrb[8].mxu1 }
 0x3f2   : > { %v2954_v49 = vpack.i.bf16 %v2674_v45, %v1258_v47  ;;  %v1177_v50 = vpop.f32.mrb[9].mxu1 }
 0x3f3   : > { %v2949_v52 = vpack.i.bf16 %v2667_v48, %v1177_v50 }
 0x3f4   : > { %v2688_v53 = vpop.f32.mrb[12].mxu0 }
 0x3f5   : > { %2945 = vrot.lane.b32.xlu0 %v2944_v41, %s3187_s20  ;;  %2950 = vrot.lane.b32.xlu1 %v2949_v52, %s3188_s30  ;;  %v1508_v54 = vpop.f32.mrb[13].mxu0 }
 0x3f6   : > { %v2811_v55 = vpack.c.bf16 %v2688_v53, %v1508_v54  ;;  %2700 = vmatprep.mubr.msk.f32.mxu0 %vm355_vm0, %v1508_v54 }
 0x3f7   : > { %2701 = vmatmul.mubr.msk.f32.vlgmr.msra.gmra.mrb[14].mxu0 %vm355_vm0, %v2688_v53 }
 0x3f8   : > { %2812 = vmatprep.subr.bf16.mxu0 %v2811_v55  ;;  %2707 = vmatprep.mubr.msk.f32.mxu0 %vm355_vm0, %v3480_v12 }
 0x3f9   : > { %2955 = vrot.lane.b32.xlu1 %v2954_v49, %s3189_s9  ;;  %2814 = vmatpush3.bf16.msra.mxu0 %v2811_v55 }
 0x3fa   : > { %2824 = vmatprep.subr.bf16.mxu0 %v3505_v23 }
 0x3ff   : > { %2708 = vmatmul.mubr.msk.f32.vlgmr.msra.gmra.mrb[14].mxu0 %vm355_vm0, %v3489_v13 }
 0x400   : > { %2826 = vmatpush3.bf16.msra.mxu0 %v3505_v23 }
 0x401   : > { %2832 = vmatprep.subr.bf16.mxu0 %v3505_v23 }
 0x463   : > { %v2941_v56 = vpop.permute.xlu0 %2940 }
 0x464   : > { %v2943_v57 = vunpack.i.h.bf16 %v2941_v56  ;;  %v2942_v58 = vunpack.i.l.bf16 %v2941_v56 }
 0x466   : > { %v1301_v63 = vsel %vm1299_vm2, %v3526_v31, %v2943_v57  ;;  %v1300_v0 = vsel %vm1299_vm2, %v3528_v32, %v2942_v58 }
 0x467   : > { %v2946_v59 = vpop.permute.xlu0 %2945  ;;  %v2951_v60 = vpop.permute.xlu1 %2950 }
 0x468   : > { %v2948_v61 = vunpack.i.h.bf16 %v2946_v59  ;;  %v2947_v62 = vunpack.i.l.bf16 %v2946_v59  ;;  %v2953_v1 = vunpack.i.h.bf16 %v2951_v60  ;;  %v2952_v2 = vunpack.i.l.bf16 %v2951_v60 }
 0x46a   : > { %v1303_v3 = vsel %vm1302_vm3, %v1300_v0, %v2947_v62  ;;  %v1304_v4 = vsel %vm1302_vm3, %v1301_v63, %v2948_v61 }
 0x46b   : > { %v2956_v7 = vpop.permute.xlu1 %2955  ;;  %v1307_v10 = vsel %vm1305_vm4, %v1304_v4, %v2953_v1  ;;  %v1306_v11 = vsel %vm1305_vm4, %v1303_v3, %v2952_v2 }
 0x46c   : > { %v2958_v8 = vunpack.i.h.bf16 %v2956_v7  ;;  %v2957_v9 = vunpack.i.l.bf16 %v2956_v7 }
 0x46e   : > { %v1309_v14 = vsel %vm1308_vm5, %v1306_v11, %v2957_v9  ;;  %v1310_v15 = vsel %vm1308_vm5, %v1307_v10, %v2958_v8 }
 0x46f   : > { %v2797_v17 = vpack.c.bf16 %v1310_v15, %v1309_v14 }
 0x471   : > { %2798 = vmatpush3.bf16.msra.mxu1 %v2797_v17 }
 0x472   : > { %2804 = vmatprep.subr.bf16.mxu1 %v2803_v16 }
 0x474   : > { %2680 = vmatmul.mubr.msk.f32.vlgmr.msra.gmra.mrb[10].mxu1 %vm355_vm0, %v3570_v18 }
 0x475   : > { %2806 = vmatpush3.bf16.msra.mxu1 %v2803_v16  ;;  %2693 = vmatprep.mubr.msk.f32.mxu1 %vm355_vm0, %v3480_v12 }
 0x476   : > { %2816 = vmatprep.subr.bf16.mxu1 %v3505_v23 }
 0x478   : > { %2694 = vmatmul.mubr.msk.f32.vlgmr.msra.gmra.mrb[2].mxu1 %vm355_vm0, %v3489_v13 }
 0x479   : > { %2818 = vmatpush3.bf16.msra.mxu1 %v3505_v23 }
 0x47a   : > { %2820 = vmatprep.subr.bf16.mxu1 %v3505_v23 }
 0x4d2   : > { %v2709_v5 = vpop.f32.mrb[14].mxu0 }
 0x4d3   : > { %v1739_v6 = vpop.f32.mrb[15].mxu0  ;;  %v1751_v27 = vmul.f32 %v2709_v5, %v2709_v5 }
 0x4d4   : > { %v1750_v13 = vmul.f32 %v1739_v6, %v1739_v6 }
 0x547   : > { %v3581_v19 = vpop.f32.mrb[10].mxu1 }
 0x548   : > { %v2681_v20 = vpop.f32.mrb[11].mxu1  ;;  %v1384_v41 = vmul.f32 %v3581_v19, %v3581_v19 }
 0x54b   : > { %v2695_v21 = vpop.f32.mrb[2].mxu1 }
 0x54c   : > { %v1753_v22 = vmul.f32 %v2709_v5, %v2695_v21  ;;  %v1583_v24 = vpop.f32.mrb[3].mxu1  ;;  %v1749_v12 = vmul.f32 %v2695_v21, %v2695_v21 }
 0x54d   : > { %v1748_v25 = vmul.f32 %v1583_v24, %v1583_v24  ;;  %v1752_v26 = vmul.f32 %v1739_v6, %v1583_v24  ;;  %2714 = vmatprep.mubr.msk.f32.mxu1 %vm355_vm0, %v1583_v24 }
 0x54e   : > { %2715 = vmatmul.mubr.msk.f32.vlgmr.msra.gmra.mrb[12].mxu1 %vm355_vm0, %v2695_v21 }
 0x54f   : > { %2822 = vmatpush3.bf16.msra.mxu1 %v3505_v23  ;;  %2721 = vmatprep.mubr.msk.f32.mxu1 %vm355_vm0, %v1739_v6 }
 0x550   : > { %2728 = vmatprep.mubr.msk.f32.mxu0 %vm355_vm0, %v1748_v25  ;;  %2828 = vmatprep.subr.bf16.mxu1 %v3505_v23 }
 0x551   : > { %2729 = vmatmul.mubr.msk.f32.vlgmr.msra.gmra.mrb[16].mxu0 %vm355_vm0, %v1749_v12 }
 0x552   : > { %2834 = vmatpush3.bf16.msra.mxu0 %v3505_v23  ;;  %2742 = vmatprep.mubr.msk.f32.mxu0 %vm355_vm0, %v1752_v26 }
 0x553   : > { %2722 = vmatmul.mubr.msk.f32.vlgmr.msra.gmra.mrb[14].mxu1 %vm355_vm0, %v2709_v5 }
 0x554   : > { %2830 = vmatpush3.bf16.msra.mxu1 %v3505_v23  ;;  %2735 = vmatprep.mubr.msk.f32.mxu1 %vm355_vm0, %v1750_v13 }
 0x555   : > { %2743 = vmatmul.mubr.msk.f32.vlgmr.msra.gmra.mrb[18].mxu0 %vm355_vm0, %v1753_v22  ;;  %2835 = vmatprep.subr.bf16.mxu1 %v3183_v46 }
 0x557   : > { %2736 = vmatmul.mubr.msk.f32.vlgmr.msra.gmra.mrb[16].mxu1 %vm355_vm0, %v1751_v27 }
 0x558   : > { %2749 = vmatprep.mubr.msk.f32.mxu1 %vm3185_vm1, %v3186_v51 }
 0x621   : > { %v2716_v28 = vpop.f32.mrb[12].mxu1 }
 0x622   : > { %v1826_v29 = vpop.f32.mrb[13].mxu1 }
 0x624   : > { %v2730_v30 = vpop.f32.mrb[16].mxu0 }
 0x625   : > { %v1988_v31 = vpop.f32.mrb[17].mxu0 }
 0x626   : > { %v2959_v32 = vpack.i.bf16 %v2730_v30, %v1988_v31  ;;  %v2723_v33 = vpop.f32.mrb[14].mxu1 }
 0x627   : > { %v1907_v34 = vpop.f32.mrb[15].mxu1 }
 0x628   : > { %v2964_v23 = vpack.i.bf16 %v2723_v33, %v1907_v34  ;;  %2960 = vrot.lane.b32.xlu1 %v2959_v32, %s3187_s20  ;;  %v2744_v35 = vpop.f32.mrb[18].mxu0 }
 0x629   : > { %v2150_v36 = vpop.f32.mrb[19].mxu0 }
 0x62a   : > { %v2974_v37 = vpack.i.bf16 %v2744_v35, %v2150_v36  ;;  %2965 = vrot.lane.b32.xlu0 %v2964_v23, %s3184_s11  ;;  %v2737_v38 = vpop.f32.mrb[16].mxu1 }
 0x62b   : > { %v2069_v39 = vpop.f32.mrb[17].mxu1 }
 0x62c   : > { %v2969_v40 = vpack.i.bf16 %v2737_v38, %v2069_v39  ;;  %2975 = vrot.lane.b32.xlu1 %v2974_v37, %s3189_s9 }
 0x62e   : > { %2970 = vrot.lane.b32.xlu0 %v2969_v40, %s3188_s30 }
 0x632   : > { %1391 = vrot.lane.b32.xlu0 %v1384_v41, %s3187_s20 }
 0x69a   : > { %v2961_v42 = vpop.permute.xlu1 %2960 }
 0x69b   : > { %v2963_v49 = vunpack.i.h.bf16 %v2961_v42  ;;  %v2962_v50 = vunpack.i.l.bf16 %v2961_v42 }
 0x69c   : > { %v2966_v43 = vpop.permute.xlu0 %2965 }
 0x69d   : > { %v2968_v44 = vunpack.i.h.bf16 %v2966_v43  ;;  %v2967_v45 = vunpack.i.l.bf16 %v2966_v43 }
 0x69e   : > { %v2976_v48 = vpop.permute.xlu1 %2975 }
 0x69f   : > { %v2192_v46 = vsel %vm1299_vm2, %v2716_v28, %v2968_v44  ;;  %v2191_v47 = vsel %vm1299_vm2, %v1826_v29, %v2967_v45  ;;  %v2978_v54 = vunpack.i.h.bf16 %v2976_v48  ;;  %v2977_v55 = vunpack.i.l.bf16 %v2976_v48 }
 0x6a0   : > { %v2971_v51 = vpop.permute.xlu0 %2970  ;;  %v2193_v56 = vsel %vm1302_vm3, %v2191_v47, %v2962_v50  ;;  %v2194_v57 = vsel %vm1302_vm3, %v2192_v46, %v2963_v49 }
 0x6a1   : > { %v2973_v52 = vunpack.i.h.bf16 %v2971_v51  ;;  %v2972_v53 = vunpack.i.l.bf16 %v2971_v51 }
 0x6a3   : > { %v2195_v58 = vsel %vm1305_vm4, %v2193_v56, %v2972_v53  ;;  %v2196_v59 = vsel %vm1305_vm4, %v2194_v57, %v2973_v52 }
 0x6a4   : > { %v1392_v60 = vpop.permute.xlu0 %1391  ;;  %v2197_v61 = vsel %vm1308_vm5, %v2195_v58, %v2977_v55  ;;  %v2198_v62 = vsel %vm1308_vm5, %v2196_v59, %v2978_v54 }
 0x6a5   : > { %v1394_v63 = vsub.f32 %v3581_v19, %v1392_v60  ;;  %v2836_v0 = vpack.c.bf16 %v2198_v62, %v2197_v61 }
 0x6a7   : > { %1403 = vrot.lane.b32.xlu0 %v1394_v63, %s3190_s13  ;;  %2837 = vmatpush3.bf16.msra.mxu1 %v2836_v0 }
 0x6aa   : > { %2750 = vmatmul.mubr.msk.f32.vlgmr.msra.gmra.mrb[18].mxu1 %vm355_vm0, %v3570_v18 }
 0x6ab   : > { %1386 = vrot.lane.b32.xlu0 %v3581_v19, %s3190_s13 }
 0x719   : > { %v1404_v1 = vpop.permute.xlu0 %1403 }
 0x71a   : > { %v1406_v2 = vadd.f32 %v1404_v1, %v1394_v63 }
 0x71c   : > { %v1407_v3 = vadd.f32 58.5225, %v1406_v2 }
 0x71d   : > { %v1387_v4 = vpop.permute.xlu0 %1386 }
 0x71e   : > { %2979 = vrcp.f32 %v1407_v3  ;;  %v1389_v7 = vmul.f32 %v1387_v4, %v3581_v19 }
 0x720   : > { %1396 = vrot.lane.b32.xlu0 %v1389_v7, %s3189_s9  ;;  %v1414_v25 = vmul.f32 2.0, %v1389_v7 }
 0x728   : > { %v2980_v8 = vpop.eup %2979 }
 0x729   : > { %1410 = vrot.lane.b32.xlu0 %v2980_v8, %s3187_s20 }
 0x72d   : > { %1416 = vrot.lane.b32.xlu0 %v1384_v41, %s3190_s13 }
 0x77d   : > { %v2265_v9 = vpop.f32.mrb[18].mxu1 }
 0x77e   : > { %v2269_v10 = vmul.f32 %v2265_v9, %v2265_v9  ;;  %v2751_v11 = vpop.f32.mrb[19].mxu1 }
 0x780   : > { %2276 = vrot.lane.b32.xlu1 %v2269_v10, %s3187_s20 }
 0x792   : > { %v1397_v14 = vpop.permute.xlu0 %1396 }
 0x793   : > { %v1399_v15 = vsub.f32 %v3581_v19, %v1397_v14  ;;  %v1415_v19 = vadd.f32 6.5025, %v1414_v25 }
 0x795   : > { %v1400_v16 = vmul.f32 2.0, %v1399_v15 }
 0x797   : > { %v1401_v17 = vadd.f32 58.5225, %v1400_v16 }
 0x79b   : > { %v1411_v18 = vpop.permute.xlu0 %1410 }
 0x79c   : > { %v1413_v5 = vmul.f32 %v1411_v18, %v1401_v17 }
 0x79e   : > { %1424 = vrot.lane.b32.xlu0 %v1413_v5, %s3191_s15 }
 0x79f   : > { %v1417_v21 = vpop.permute.xlu0 %1416 }
 0x7a0   : > { %v1419_v22 = vadd.f32 %v1417_v21, %v1384_v41 }
 0x7a2   : > { %v1420_v24 = vadd.f32 6.5025, %v1419_v22 }
 0x7a4   : > { %2981 = vrcp.f32 %v1420_v24 }
 0x7ae   : > { %v2982_v26 = vpop.eup %2981 }
 0x7af   : > { %v1422_v12 = vmul.f32 %v2982_v26, %v1415_v19 }
 0x7f2   : > { %v2277_v6 = vpop.permute.xlu1 %2276 }
 0x7f3   : > { %v2279_v20 = vsub.f32 %v2265_v9, %v2277_v6 }
 0x7f5   : > { %2288 = vrot.lane.b32.xlu1 %v2279_v20, %s3190_s13 }
 0x7f9   : > { %2271 = vrot.lane.b32.xlu1 %v2265_v9, %s3190_s13 }
 0x810   : > { %v1425_v13 = vpop.permute.xlu0 %1424 }
 0x811   : > { %v1427_v27 = vmul.f32 %v1425_v13, %v1422_v12 }
 0x813   : > { %v1429_v28 = vsel %vm1428_vm6, %v1427_v27, 0.0 }
 0x814   : > { %1430 = vadd.xlane.f32.xlu0 %v1429_v28 }
 0x867   : > { %v2289_v29 = vpop.permute.xlu1 %2288 }
 0x868   : > { %v2291_v30 = vadd.f32 %v2289_v29, %v2279_v20 }
 0x86a   : > { %v2292_v31 = vadd.f32 58.5225, %v2291_v30 }
 0x86b   : > { %v2272_v32 = vpop.permute.xlu1 %2271 }
 0x86c   : > { %2983 = vrcp.f32 %v2292_v31  ;;  %v2274_v33 = vmul.f32 %v2272_v32, %v2265_v9 }
 0x86e   : > { %2281 = vrot.lane.b32.xlu1 %v2274_v33, %s3189_s9  ;;  %v2299_v50 = vmul.f32 2.0, %v2274_v33 }
 0x870   : > { %v2300_v52 = vadd.f32 6.5025, %v2299_v50 }
 0x876   : > { %v2984_v34 = vpop.eup %2983 }
 0x877   : > { %2295 = vrot.lane.b32.xlu1 %v2984_v34, %s3187_s20 }
 0x87b   : > { %2301 = vrot.lane.b32.xlu1 %v2269_v10, %s3190_s13 }
 0x8a1   : > { %v1431_v23 = vpop.xlane.xlu0 %1430 }
 0x8a2   : > { %v1432_v35 = vrot.slane %v1431_v23, 4 }
 0x8a4   : > { %v1433_v36 = vadd.f32 %v1432_v35, %v1431_v23 }
 0x8a6   : > { %v1434_v37 = vrot.slane %v1433_v36, 2 }
 0x8a8   : > { %v1435_v38 = vadd.f32 %v1434_v37, %v1433_v36 }
 0x8aa   : > { %v1436_v39 = vrot.slane %v1435_v38, 1 }
 0x8ac   : > { %v1437_v40 = vadd.f32 %v1436_v39, %v1435_v38 }
 0x8ae   : > { %2846 = vpush %v1437_v40 }
 0x8df   : > { %s2847_s10 = spop %2846 }
 0x8e0   : > { %v2282_v41 = vpop.permute.xlu1 %2281  ;;  %s1439_s14 = smul.f32 0.027777778, %s2847_s10  ;;  %s2329_s10 = scalar_lea.sflag [#allocation4], %s3436_s12 }
 0x8e1   : > { %v2284_v42 = vsub.f32 %v2265_v9, %v2282_v41 }
 0x8e2   : > { %s1440_s11 = smax.f32 %s3192_s23, %s1439_s14  ;;  %s3193_s14 = smov [#allocation10]  }
 0x8e3   : > { %v2285_v43 = vmul.f32 2.0, %v2284_v42 }
 0x8e5   : > { %v2286_v44 = vadd.f32 58.5225, %v2285_v43 }
 0x8e9   : > { %v2296_v45 = vpop.permute.xlu1 %2295 }
 0x8ea   : > { %v2298_v46 = vmul.f32 %v2296_v45, %v2286_v44 }
 0x8ec   : > { %2309 = vrot.lane.b32.xlu1 %v2298_v46, %s3191_s15  ;;  %s3641_s15 = scalar_lea.hbm %s3692_s7, %s2497_s21 }
 0x8ed   : > { %v2302_v47 = vpop.permute.xlu1 %2301 }
 0x8ee   : > { %v2304_v48 = vadd.f32 %v2302_v47, %v2269_v10 }
 0x8f0   : > { %v2305_v49 = vadd.f32 6.5025, %v2304_v48 }
 0x8f2   : > { %2985 = vrcp.f32 %v2305_v49 }
 0x8fc   : > { %v2986_v51 = vpop.eup %2985 }
 0x8fd   : > { %v2307_v53 = vmul.f32 %v2986_v51, %v2300_v52 }
 0x95e   : > { %v2310_v54 = vpop.permute.xlu1 %2309 }
 0x95f   : > { %v2312_v55 = vmul.f32 %v2310_v54, %v2307_v53 }
 0x961   : > { %v2313_v56 = vsel %vm1428_vm6, %v2312_v55, 0.0 }
 0x962   : > { %2314 = vadd.xlane.f32.xlu1 %v2313_v56 }
 0x9ef   : > { %v2315_v57 = vpop.xlane.xlu1 %2314 }
 0x9f0   : > { %v2316_v58 = vrot.slane %v2315_v57, 4 }
 0x9f2   : > { %v2317_v59 = vadd.f32 %v2316_v58, %v2315_v57 }
 0x9f4   : > { %v2318_v60 = vrot.slane %v2317_v59, 2 }
 0x9f6   : > { %v2319_v61 = vadd.f32 %v2318_v60, %v2317_v59 }
 0x9f8   : > { %v2320_v62 = vrot.slane %v2319_v61, 1 }
 0x9fa   : > { %v2321_v63 = vadd.f32 %v2320_v62, %v2319_v61 }
 0x9fc   : > { %2848 = vpush %v2321_v63 }
 0xa2d   : > { %s2849_s8 = spop %2848 }
 0xa2e   : > { %s2323_s17 = smul.f32 0.027777778, %s2849_s8  ;;  %s3105_s8 = sshll.u32 %s3193_s14, 4  ;;  %s3106_s8 = int_to_ptr.vmem [resolvable:$false] %s3105_s8 }
 0xa2f   : > { %p3108_p12 = scmp.lt.s32.totalorder %s3643_s29, %s3106_s8 }
 0xa30   : > { %s2324_s20 = smax.f32 %s3192_s23, %s2323_s17  ;;  %s3107_s17 = scalar_lea.vmem %s3106_s8, 32 }
 0xa31   : > { %s2325_s30 = sadd.f32 %s2324_s20, %s1440_s11  ;;  %p3109_p1 = scmp.lt.s32.totalorder %s3107_s17, %s3101_s28 }
 0xa33   : > { %v2326_v0 = vstv %s2325_s30  ;;  %p3110_p2 = por %p3109_p1, %p3108_p12 }
 0xa34   : > { %2327 = vst [vmem:[%s338_s16] sm:$0x1] %v2326_v0 }
 0xa35   : > { %p3111_p4 = pnand %p3110_p2, %p3104_p7 }
 0xa37   : > { %3114 = shalt.err (!%p3111_p4)
}
 0xa38   : > { %s3115_s12 = scalar_lea.hbm %s3641_s15, 16  ;;  %s3119_s23 = scalar_lea.hbm %s3692_s7, 32 }
 0xa39   : > { %p3116_p9 = scmp.ne.s32.totalorder %s3641_s15, %s3115_s12  ;;  %p3120_p11 = scmp.lt.u32.totalorder %s3641_s15, %s3692_s7 }
 0xa3a   : > { %p3121_p13 = scmp.lt.u32.totalorder %s3119_s23, %s3115_s12  ;;  %p3123_p10 = scmp.lt.u32.totalorder %s3115_s12, %s3641_s15 }
 0xa3b   : > { %p3117_p0 = pnand %p3116_p9, %p3385_p5 }
 0xa3c   : > { %p3122_p6 = por %p3121_p13, %p3120_p11 }
 0xa3d   : > { %p3118_p8 = pneg %p3117_p0 }
 0xa3e   : > { %p3124_p3 = por %p3123_p10, %p3122_p6 }
 0xa40   : > { %p3125_p7 = pnand %p3124_p3, %p3118_p8 }
 0xa42   : > { %3128 = shalt.err (!%p3125_p7)
}
 0xa43   : > { %2864 = dma.vmem_to_hbm [thread:$0]  (%p3385_p5), %s3643_s29, 16, %s3641_s15, %s2329_s10  }
 0xa44 PF: > { %s3712_s30 = sld [smem:[#allocation15_spill]]  ;;  %s2353_s9 = sand.u32 1, %s3163_s24  }
 0xa45   : > { %p3714_p1 = scmp.ge.s32.totalorder %s3175_s27, 2  ;;  %s2354_s13 = scalar_lea.sflag [#allocation4], %s2353_s9 }
 0xa4a   : > { %p3713_p12 = scmp.ne.s32.totalorder %s3712_s30, 0 }
 0xa4c   : > { %p2881_p2 = pnand %p3714_p1, %p3713_p12 }
 0xa4e   : > { %3158 = dma.done.wait (!%p2881_p2), %s2354_s13, 16  }
 0xa4f   : > { %3160 = vsyncadd (!%p2881_p2), %s2354_s13, 4294967280  ;;  %p22_p4 = scmp.ge.s32.totalorder %s3371_s22, 4   ;;  %s3715_s24 = smov %s3167_s25 }
 0xa50   : > { %s3716_s25 = smov %s3171_s26  ;;  %s3717_s26 = smov %s3381_s18 }
 0xa51   : > { %s3718_s27 = smov %s3371_s22  ;;  %24 = sbr.rel (!%p22_p4) target bundleno = 7 (0x7), region = 105 }
 0xa58   :  { %2358 = vsyncpa [#allocation3], 1 }
 0xa59   :  { %2360 = vsyncpa [#allocation3 + $0x1], 1 }
 0xa5a   :  { %2361 = vsyncpa [#allocation6], 1 }
 0xa5b   :  { %2362 = vsyncpa [#allocation9], 1 }
 0xa5c   :  { %2363 = vsyncpa [#allocation4], 1 }
 0xa5d   :  { %2365 = vsyncpa [#allocation4 + $0x1], 1 }

// kernel: tpu_custom_call.1
= control target key start
LH: loop header
LB: loop body
LE: loop exit
PB: predicated region body
PF: predicated region fallthrough
CT: control target
= control target key end

     0   :  { %12 = vsyncpa [#allocation3], 0  ;;  %s3685_s0 = inlined_call_operand.hbm [shape: f32[4,16,16], index: 0, kind: input, shape index: {}]   ;;  %s3686_s1 = inlined_call_operand.vmem [shape: f32[16,16], index: 1, kind: input, shape index: {}]   ;;  %s3687_s2 = inlined_call_operand.hbm [shape: f32[16,16], index: 2, kind: input, shape index: {}]   ;;  %s3688_s3 = inlined_call_operand.vmem [shape: f32[16,16], index: 3, kind: input, shape index: {}]   ;;  %s3689_s4 = inlined_call_operand.hbm [shape: f32[16,16], index: 4, kind: input, shape index: {}]   ;;  %s3690_s5 = inlined_call_operand.hbm [shape: f32[6,16], index: 5, kind: input, shape index: {}]   ;;  %s3691_s6 = inlined_call_operand.vmem [shape: f32[16,6], index: 6, kind: input, shape index: {}]   ;;  %s3692_s7 = inlined_call_operand.hbm [shape: f32[2,1,128], index: 7, kind: output, shape index: {}]  }
   0x1   :  { %14 = vsyncpa [#allocation3 + $0x1], 0 }
   0x2   :  { %15 = vsyncpa [#allocation6], 0 }
   0x3   :  { %16 = vsyncpa [#allocation9], 0 }
   0x4   :  { %17 = vsyncpa [#allocation4], 0 }
   0x5   :  { %19 = vsyncpa [#allocation4 + $0x1], 0  ;;  %s3234_s24 = smov 0   ;;  %s3236_s25 = smov 0  }
   0x6   :  { %s3238_s26 = smov 0   ;;  %s3240_s27 = smov 0  }
   0x7 LB: > { %s3255_s28 = sadd.s32 4294967295, %s3175_s27   ;;  %s2436_s29 = sadd.s32 4294967294, %s3175_s27   ;;  %s3175_s27 = sphi %s3240_s27, %s3718_s27   ;;  %s3171_s26 = sphi %s3238_s26, %s3717_s26   ;;  %s3167_s25 = sphi %s3236_s25, %s3716_s25   ;;  %s3163_s24 = sphi %s3234_s24, %s3715_s24  }
   0x8   : > { %p45_p0 = scmp.ne.s32.totalorder %s3167_s25, %s3163_s24  ;;  %p3693_p1 = scmp.eq.s32.totalorder %s3255_s28, 0 }
   0x9   : > { %p201_p3 = scmp.eq.s32.totalorder %s2436_s29, 1  ;;  %p2437_p5 = scmp.ge.s32.totalorder %s3175_s27, 1 }
   0xa   : > { %p3264_p4 = por %p3693_p1, %p45_p0  ;;  %p208_p7 = scmp.lt.s32.totalorder %s3175_s27, 3 }
   0xb   : > { %p3269_p6 = por %p201_p3, %p45_p0  ;;  %s3177_s10 = smov [#allocation5]  }
   0xc   : > { %s3697_s30 = scalar_select %p3264_p4, 1, 0 }
   0xd   : > { %s3698_s8 = scalar_select %p3269_p6, 1, 0 }
   0xe   : > { %p3274_p8 = pnand %p2437_p5, %p208_p7  ;;  %s223_s11 = sshll.u32 %s3177_s10, 4  ;;  %s3278_s11 = int_to_ptr.vmem [resolvable:$true] %s223_s11 }
   0xf   : > { %3699 = sst [smem:[#allocation15_spill]] %s3698_s8  ;;  %s3178_s13 = smov [#allocation7]  }
  0x10   : > { %s3700_s9 = scalar_select %p3274_p8, 1, 0 }
  0x11   : > { %p2866_p9 = pneg %p3274_p8  ;;  %s239_s14 = sshll.u32 %s3178_s13, 4  ;;  %s3289_s14 = int_to_ptr.vmem [resolvable:$true] %s239_s14 }
  0x12   : > { %s3179_s15 = smov [#allocation8]   ;;  %s2987_s19 = scalar_lea.hbm %s3687_s2, 256 }
  0x13   : > { %p3285_p11 = pnand %p2866_p9, %p3693_p1  ;;  %s3291_s16 = sshll.u32 %s3179_s15, 4  ;;  %s254_s16 = int_to_ptr.vmem [resolvable:$true] %s3291_s16 }
  0x14   : > { %p2988_p12 = scmp.ne.s32.totalorder %s3687_s2, %s2987_s19  ;;  %p2994_p5 = scmp.lt.u32.totalorder %s2987_s19, %s3687_s2 }
  0x15   : > { %p3301_p13 = pneg %p3285_p11 }
  0x17   : > { %p2990_p0 = pnand %p3301_p13, %p2988_p12 }
  0x19   : > { %p2991_p3 = pneg %p2990_p0 }
  0x1b   : > { %p2996_p7 = pnand %p2994_p5, %p2991_p3 }
  0x1d   : > { %2999 = shalt.err (!%p2996_p7)
}
  0x1e   : > { %s3000_s10 = scalar_lea.vmem %s3278_s11, 256  ;;  %p3008_p2 = scmp.lt.s32.totalorder %s3278_s11, %s3278_s11 }
  0x1f   : > { %p3001_p9 = scmp.ne.s32.totalorder %s3278_s11, %s3000_s10  ;;  %p3009_p6 = scmp.lt.s32.totalorder %s3000_s10, %s3000_s10 }
  0x21   : > { %p3003_p10 = pnand %p3001_p9, %p3301_p13  ;;  %p3010_p12 = por %p3009_p6, %p3008_p2 }
  0x23   : > { %p3004_p1 = pneg %p3003_p10 }
  0x25   : > { %p3011_p0 = pnand %p3010_p12, %p3004_p1 }
  0x27   : > { %3014 = shalt.err (!%p3011_p0)
}
  0x28   : > { %s3180_s13 = smov 128   ;;  %s3181_s15 = smov 8  }
  0x29   : > { %2869 = dma.hbm_to_vmem [thread:$0]  (!%p3285_p11), %s3687_s2, 256, %s3278_s11, [#allocation6], %s3180_s13, %s3180_s13, %s3181_s15  }
  0x2a   : > { %s3015_s21 = scalar_lea.hbm %s3689_s4, 256 }
  0x2b   : > { %p3016_p1 = scmp.ne.s32.totalorder %s3689_s4, %s3015_s21  ;;  %p3022_p10 = scmp.lt.u32.totalorder %s3015_s21, %s3689_s4 }
  0x2d   : > { %p3018_p2 = pnand %p3016_p1, %p3301_p13 }
  0x2f   : > { %p3019_p6 = pneg %p3018_p2 }
  0x31   : > { %p3024_p3 = pnand %p3022_p10, %p3019_p6 }
  0x33   : > { %3027 = shalt.err (!%p3024_p3)
}
  0x34   : > { %s3028_s11 = scalar_lea.vmem %s3289_s14, 256  ;;  %p3036_p12 = scmp.lt.s32.totalorder %s3289_s14, %s3289_s14 }
  0x35   : > { %p3029_p5 = scmp.ne.s32.totalorder %s3289_s14, %s3028_s11  ;;  %p3037_p0 = scmp.lt.s32.totalorder %s3028_s11, %s3028_s11 }
  0x37   : > { %p3031_p7 = pnand %p3029_p5, %p3301_p13  ;;  %p3038_p1 = por %p3037_p0, %p3036_p12 }
  0x39   : > { %p3032_p9 = pneg %p3031_p7 }
  0x3b   : > { %p3039_p2 = pnand %p3038_p1, %p3032_p9 }
  0x3d   : > { %3042 = shalt.err (!%p3039_p2)
}
  0x3e   : > { %2872 = dma.hbm_to_vmem [thread:$0]  (!%p3285_p11), %s3689_s4, 256, %s3289_s14, [#allocation6], %s3180_s13, %s3180_s13, %s3181_s15  }
  0x3f   : > { %s3043_s20 = scalar_lea.hbm %s3690_s5, 128 }
  0x40   : > { %p3044_p6 = scmp.ne.s32.totalorder %s3690_s5, %s3043_s20  ;;  %p3050_p5 = scmp.lt.u32.totalorder %s3043_s20, %s3690_s5 }
  0x42   : > { %p3046_p10 = pnand %p3044_p6, %p3301_p13 }
  0x44   : > { %p3047_p3 = pneg %p3046_p10 }
  0x46   : > { %p3052_p7 = pnand %p3050_p5, %p3047_p3 }
  0x48   : > { %3055 = shalt.err (!%p3052_p7)
}
  0x49   : > { %s3056_s11 = scalar_lea.vmem %s254_s16, 128  ;;  %p3064_p1 = scmp.lt.s32.totalorder %s254_s16, %s254_s16 }
  0x4a   : > { %p3057_p9 = scmp.ne.s32.totalorder %s254_s16, %s3056_s11  ;;  %p3065_p2 = scmp.lt.s32.totalorder %s3056_s11, %s3056_s11 }
  0x4c   : > { %p3059_p12 = pnand %p3057_p9, %p3301_p13  ;;  %p3066_p4 = por %p3065_p2, %p3064_p1 }
  0x4e   : > { %p3060_p0 = pneg %p3059_p12 }
  0x50   : > { %p3067_p8 = pnand %p3066_p4, %p3060_p0 }
  0x52   : > { %3070 = shalt.err (!%p3067_p8)
}
  0x53   : > { %2875 = dma.hbm_to_vmem [thread:$0]  (!%p3285_p11), %s3690_s5, 128, %s254_s16, [#allocation9]  }
  0x54   : > { %s3371_s22 = sadd.s32 1, %s3175_s27   ;;  %s32_s12 = sadd.s32 1, %s3171_s26 }
  0x55   : > { %s29_s17 = ssub.s32 %s3175_s27, %s3371_s22  ;;  %p39_p8 = scmp.ne.s32.totalorder %s3171_s26, %s3167_s25 }
  0x56   : > { %p30_p4 = scmp.eq.s32.totalorder %s29_s17, 0  ;;  %p40_p13 = scmp.eq.s32.totalorder %s3175_s27, 0 }
  0x57   : > { %p2887_p6 = scmp.lt.s32.totalorder %s3175_s27, 2  ;;  %p3703_p3 = scmp.eq.s32.totalorder %s3255_s28, 1 }
  0x58   : > { %s3381_s18 = scalar_select %p30_p4, %s3171_s26, %s32_s12  }
  0x59   : > { %p41_p10 = por %p40_p13, %p39_p8  ;;  %p3385_p5 = por %p3703_p3, %p39_p8 }
  0x5a   : > { %s267_s20 = sand.u32 1, %s3171_s26   ;;  %s2501_s21 = sshll.u32 %s3175_s27, 9 }
  0x5b   : > { %s2442_s16 = sshll.u32 %s267_s20, 5  ;;  %s3394_s10 = scalar_lea.hbm %s3685_s0, %s2501_s21 }
  0x5c   : > { %s271_s11 = scalar_lea.vmem [#allocation2], %s2442_s16  ;;  %p3396_p11 = pnand %p2887_p6, %p41_p10 }
  0x5d   : > { %s279_s14 = sshll.u32 %s271_s11, 4  ;;  %s3402_s17 = scalar_lea.sflag [#allocation3], %s267_s20  ;;  %s3400_s14 = int_to_ptr.vmem [resolvable:$true] %s279_s14 }
  0x5e   : > { %s3071_s12 = scalar_lea.hbm %s3394_s10, 512  ;;  %p3073_p9 = pneg %p3396_p11 }
  0x5f   : > { %p3072_p7 = scmp.ne.s32.totalorder %s3394_s10, %s3071_s12  ;;  %s3076_s23 = scalar_lea.hbm %s3685_s0, 1024 }
  0x60   : > { %p3077_p1 = scmp.lt.u32.totalorder %s3394_s10, %s3685_s0  ;;  %p3078_p2 = scmp.lt.u32.totalorder %s3076_s23, %s3071_s12 }
  0x61   : > { %p3074_p12 = pnand %p3073_p9, %p3072_p7  ;;  %p3080_p8 = scmp.lt.u32.totalorder %s3071_s12, %s3394_s10 }
  0x62   : > { %p3079_p4 = por %p3078_p2, %p3077_p1 }
  0x63   : > { %p3075_p0 = pneg %p3074_p12 }
  0x64   : > { %p3081_p13 = por %p3080_p8, %p3079_p4 }
  0x66   : > { %p3082_p6 = pnand %p3081_p13, %p3075_p0 }
  0x68   : > { %3085 = shalt.err (!%p3082_p6)
}
  0x69   : > { %s3086_s20 = scalar_lea.vmem %s3400_s14, 512  ;;  %s3182_s21 = smov [#allocation2]  }
  0x6a   : > { %p3087_p10 = scmp.ne.s32.totalorder %s3400_s14, %s3086_s20  ;;  %s3091_s16 = sshll.u32 %s3182_s21, 4  ;;  %s3092_s16 = int_to_ptr.vmem [resolvable:$false] %s3091_s16 }
  0x6b   : > { %s3093_s29 = scalar_lea.vmem %s3092_s16, 1024  ;;  %p3094_p12 = scmp.lt.s32.totalorder %s3400_s14, %s3092_s16 }
  0x6c   : > { %p3089_p3 = pnand %p3087_p10, %p3073_p9  ;;  %p3095_p1 = scmp.lt.s32.totalorder %s3093_s29, %s3086_s20 }
  0x6e   : > { %p3090_p7 = pneg %p3089_p3  ;;  %p3096_p2 = por %p3095_p1, %p3094_p12 }
  0x70   : > { %p3097_p4 = pnand %p3096_p2, %p3090_p7 }
  0x72   : > { %3100 = shalt.err (!%p3097_p4)
}
  0x73   : > { %2879 = dma.hbm_to_vmem [thread:$0]  (!%p3396_p11), %s3394_s10, 512, %s3400_s14, %s3402_s17, %s3180_s13, %s3180_s13, %s3181_s15  }
  0x74   : > { %p3706_p9 = scmp.ne.s32.totalorder %s3700_s9, 0 }
  0x75   : > { %s3436_s12 = sand.u32 (!%p3706_p9), 1, %s3167_s25   ;;  %p3707_p0 = scmp.ne.s32.totalorder (!%p3706_p9), %s3697_s30, 0 }
  0x76   : > { %291 = sbr.rel (%p3706_p9) target bundleno = 2628 (0xa44), region = 48  ;;  %s2447_s23 = sshll.u32 (!%p3706_p9), %s3436_s12, 5 }
  0x77   : > { %s294_s11 = scalar_lea.sflag (!%p3706_p9), [#allocation3], %s3436_s12  ;;  %s297_s20 = scalar_lea.vmem (!%p3706_p9), [#allocation2], %s2447_s23 }
  0x7d   : > { %3146 = dma.done.wait (%p3707_p0), %s294_s11, 512  }
  0x7e   : > { %3148 = vsyncadd (%p3707_p0), %s294_s11, 4294966784  ;;  %p3708_p8 = scmp.eq.s32.totalorder %s3255_s28, 0 }
  0x80   : > { %3150 = dma.done.wait (%p3708_p8), [#allocation6], 512   ;;  %p3709_p11 = pmov %p3708_p8 }
  0x81   : > { %p3710_p13 = pmov %p3708_p8 }
  0x82   : > { %3152 = vsyncadd (%p3709_p11), [#allocation6], 4294966784 }
  0x83   : > { %3154 = dma.done.wait (%p3710_p13), [#allocation9], 128   ;;  %p3711_p6 = pmov %p3708_p8 }
  0x84   : > { %vm355_vm0 = vcmask 130048   ;;  %v342_v0 = vld [vmem:[#allocation5] sm:$0xff]  ;;  %v343_v1 = vld [vmem:[#allocation5 + $0x8] sm:$0xff]  ;;  %v3455_v5 = vld [vmem:[%s297_s20 + $0x10] sm:$0xff]  ;;  %v3183_v46 = vmov 0.0|0.0   ;;  %s3184_s11 = smov 6  }
  0x85   : > { %3156 = vsyncadd (%p3711_p6), [#allocation9], 4294967168  ;;  %v351_v2 = vld [vmem:[%s297_s20] sm:$0xff]  ;;  %v2752_v3 = vpack.c.bf16 %v343_v1, %v342_v0  ;;  %v352_v4 = vld [vmem:[%s297_s20 + $0x8] sm:$0xff]  ;;  %vm3185_vm1 = vmmov 0   ;;  %v3186_v51 = vmov 0.0  }
  0x86   : > { %2596 = vmatprep.mubr.msk.f32.mxu0 %vm355_vm0, %v351_v2  ;;  %2606 = vmatprep.mubr.msk.f32.mxu1 %vm355_vm0, %v351_v2  ;;  %v3459_v6 = vld [vmem:[%s297_s20 + $0x18] sm:$0xff]  ;;  %v346_v7 = vld [vmem:[#allocation7] sm:$0xff]  ;;  %v3468_v10 = vld [vmem:[%s3686_s1] sm:$0xff]  ;;  %v2764_v11 = vpack.c.bf16 %v352_v4, %v351_v2  ;;  %s3187_s20 = smov 12   ;;  %s3188_s30 = smov 18   ;;  %vm1299_vm2 = vcmask 48128  }
  0x87   : > { %2753 = vmatprep.subr.bf16.mxu0 %v2752_v3  ;;  %v347_v8 = vld [vmem:[#allocation7 + $0x8] sm:$0xff]  ;;  %v3480_v12 = vld [vmem:[%s3688_s3] sm:$0xff]  ;;  %v3489_v13 = vld [vmem:[%s3688_s3 + $0x8] sm:$0xff]  ;;  %s3189_s9 = smov 24   ;;  %vm1302_vm3 = vcmask 97280   ;;  %vm1305_vm4 = vcmask 146432  }
  0x88   : > { %2755 = vmatpush3.bf16.msra.mxu0 %v2752_v3  ;;  %v3463_v9 = vpack.c.bf16 %v347_v8, %v346_v7  ;;  %v341_v17 = vld [vmem:[%s3686_s1 + $0x8] sm:$0xff]  ;;  %v349_v21 = vld [vmem:[%s3691_s6] sm:$0xff]  ;;  %vm1308_vm5 = vcmask 195584   ;;  %s3190_s13 = smov 122   ;;  %s3191_s15 = smov 104   ;;  %vm1428_vm6 = vcmask 46080  }
  0x89   : > { %v350_v22 = vld [vmem:[%s3691_s6 + $0x8] sm:$0xff]  ;;  %s2497_s21 = sshll.u32 %s3255_s28, 4  ;;  %s338_s16 = scalar_lea.vmem [#allocation10], %s3436_s12 }
  0x8a   : > { %2757 = vmatprep.subr.bf16.mxu1 %v3463_v9  ;;  %v3505_v23 = vpack.c.bf16 %v350_v22, %v349_v21  ;;  %s2341_s29 = sshll.u32 %s338_s16, 4  ;;  %s3192_s23 = smov 0.0   ;;  %s3643_s29 = int_to_ptr.vmem [resolvable:$true] %s2341_s29 }
  0x8b   : > { %2597 = vmatmul.mubr.msk.f32.vlgmr.msra.gmra.mrb[0].mxu0 %vm355_vm0, %v352_v4  ;;  %2759 = vmatpush3.bf16.msra.mxu1 %v3463_v9  ;;  %s3101_s28 = scalar_lea.vmem %s3643_s29, 16 }
  0x8c   : > { %2599 = vmatprep.mubr.msk.f32.mxu0 %vm355_vm0, %v3455_v5  ;;  %2765 = vmatprep.subr.bf16.mxu1 %v2764_v11  ;;  %p3102_p10 = scmp.ne.s32.totalorder %s3643_s29, %s3101_s28 }
  0x8e   : > { %2607 = vmatmul.mubr.msk.f32.vlgmr.msra.gmra.mrb[0].mxu1 %vm355_vm0, %v352_v4  ;;  %p3103_p3 = pnand %p3102_p10, %p3385_p5 }
  0x8f   : > { %2600 = vmatmul.mubr.msk.f32.gmra.mrb[2].mxu0 %vm355_vm0, %v3459_v6  ;;  %2609 = vmatprep.mubr.msk.f32.mxu1 %vm355_vm0, %v3455_v5 }
  0x90   : > { %2616 = vmatprep.mubr.msk.f32.mxu0 %vm355_vm0, %v3468_v10  ;;  %2767 = vmatpush3.bf16.msra.mxu1 %v2764_v11  ;;  %p3104_p7 = pneg %p3103_p3 }
  0x91   : > { %2777 = vmatprep.subr.bf16.mxu1 %v3505_v23 }
  0x92   : > { %2610 = vmatmul.mubr.msk.f32.gmra.mrb[2].mxu1 %vm355_vm0, %v3459_v6 }
  0x93   : > { %2623 = vmatprep.mubr.msk.f32.mxu1 %vm355_vm0, %v3480_v12 }
  0x96   : > { %2624 = vmatmul.mubr.msk.f32.vlgmr.msra.gmra.mrb[0].mxu1 %vm355_vm0, %v3489_v13 }
  0x97   : > { %2779 = vmatpush3.bf16.msra.mxu1 %v3505_v23 }
  0x98   : > { %2781 = vmatprep.subr.bf16.mxu1 %v3505_v23 }
 0x15e   : > { %v2598_v14 = vpop.f32.mrb[0].mxu0 }
 0x15f   : > { %v434_v15 = vpop.f32.mrb[1].mxu0 }
 0x160   : > { %v2760_v16 = vpack.c.bf16 %v2598_v14, %v434_v15 }
 0x162   : > { %2761 = vmatprep.subr.bf16.mxu0 %v2760_v16  ;;  %v2601_v18 = vpop.f32.mrb[2].mxu0 }
 0x163   : > { %2763 = vmatpush3.bf16.msra.mxu0 %v2760_v16  ;;  %v444_v19 = vpop.f32.mrb[3].mxu0  ;;  %v2803_v16 = vpack.c.bf16 %v3459_v6, %v3455_v5 }
 0x164   : > { %2769 = vmatprep.subr.bf16.mxu0 %v3463_v9  ;;  %v2799_v20 = vpack.c.bf16 %v2601_v18, %v444_v19  ;;  %v3570_v18 = vld [vmem:[#allocation8] sm:$0x3f] }
 0x166   : > { %2617 = vmatmul.mubr.msk.f32.vlgmr.msra.gmra.mrb[4].mxu0 %vm355_vm0, %v341_v17 }
 0x167   : > { %2771 = vmatpush3.bf16.msra.mxu0 %v3463_v9 }
 0x169   : > { %v2625_v24 = vpop.f32.mrb[0].mxu1 }
 0x16a   : > { %v691_v25 = vpop.f32.mrb[1].mxu1  ;;  %v857_v30 = vmul.f32 %v2625_v24, %v2625_v24 }
 0x16b   : > { %2644 = vmatprep.mubr.msk.f32.mxu1 %vm355_vm0, %v691_v25  ;;  %v856_v29 = vmul.f32 %v691_v25, %v691_v25 }
 0x16c   : > { %2645 = vmatmul.mubr.msk.f32.vlgmr.msra.gmra.mrb[4].mxu1 %vm355_vm0, %v2625_v24 }
 0x16d   : > { %2783 = vmatpush3.bf16.msra.mxu1 %v3505_v23 }
 0x16e   : > { %2789 = vmatprep.subr.bf16.mxu1 %v3505_v23 }
 0x239   : > { %v2618_v26 = vpop.f32.mrb[4].mxu0 }
 0x23a   : > { %v610_v27 = vpop.f32.mrb[5].mxu0 }
 0x23b   : > { %v2772_v28 = vpack.c.bf16 %v2618_v26, %v610_v27  ;;  %2630 = vmatprep.mubr.msk.f32.mxu0 %vm355_vm0, %v610_v27 }
 0x23c   : > { %2631 = vmatmul.mubr.msk.f32.vlgmr.msra.gmra.mrb[6].mxu0 %vm355_vm0, %v2618_v26 }
 0x23d   : > { %2773 = vmatprep.subr.bf16.mxu0 %v2772_v28  ;;  %2637 = vmatprep.mubr.msk.f32.mxu0 %vm355_vm0, %v3480_v12 }
 0x23e   : > { %2775 = vmatpush3.bf16.msra.mxu0 %v2772_v28 }
 0x23f   : > { %2785 = vmatprep.subr.bf16.mxu0 %v3505_v23  ;;  %v3526_v31 = vpop.f32.mrb[4].mxu1 }
 0x240   : > { %v3528_v32 = vpop.f32.mrb[5].mxu1 }
 0x244   : > { %2638 = vmatmul.mubr.msk.f32.vlgmr.msra.gmra.mrb[6].mxu0 %vm355_vm0, %v3489_v13 }
 0x245   : > { %2787 = vmatpush3.bf16.msra.mxu0 %v3505_v23  ;;  %2658 = vmatprep.mubr.msk.f32.mxu0 %vm355_vm0, %v856_v29 }
 0x246   : > { %2793 = vmatprep.subr.bf16.mxu0 %v3505_v23 }
 0x248   : > { %2659 = vmatmul.mubr.msk.f32.vlgmr.msra.gmra.mrb[8].mxu0 %vm355_vm0, %v857_v30 }
 0x249   : > { %2795 = vmatpush3.bf16.msra.mxu0 %v3505_v23 }
 0x24a   : > { %2800 = vmatprep.subr.bf16.mxu0 %v2799_v20 }
 0x317   : > { %v2639_v33 = vpop.f32.mrb[6].mxu0 }
 0x318   : > { %v861_v34 = vmul.f32 %v2639_v33, %v2625_v24  ;;  %v847_v35 = vpop.f32.mrb[7].mxu0  ;;  %v859_v39 = vmul.f32 %v2639_v33, %v2639_v33 }
 0x319   : > { %v858_v36 = vmul.f32 %v847_v35, %v847_v35  ;;  %v860_v37 = vmul.f32 %v847_v35, %v691_v25  ;;  %2651 = vmatprep.mubr.msk.f32.mxu1 %vm355_vm0, %v847_v35 }
 0x31a   : > { %2652 = vmatmul.mubr.msk.f32.vlgmr.msra.gmra.mrb[6].mxu1 %vm355_vm0, %v2639_v33 }
 0x31b   : > { %2791 = vmatpush3.bf16.msra.mxu1 %v3505_v23  ;;  %2665 = vmatprep.mubr.msk.f32.mxu1 %vm355_vm0, %v858_v36  ;;  %v2660_v38 = vpop.f32.mrb[8].mxu0 }
 0x31c   : > { %2672 = vmatprep.mubr.msk.f32.mxu0 %vm355_vm0, %v860_v37  ;;  %v1096_v40 = vpop.f32.mrb[9].mxu0  ;;  %2796 = vmatprep.subr.bf16.mxu1 %v3183_v46 }
 0x31d   : > { %2673 = vmatmul.mubr.msk.f32.vlgmr.msra.gmra.mrb[10].mxu0 %vm355_vm0, %v861_v34  ;;  %v2944_v41 = vpack.i.bf16 %v2660_v38, %v1096_v40 }
 0x31e   : > { %2802 = vmatpush3.bf16.msra.mxu0 %v2799_v20  ;;  %2666 = vmatmul.mubr.msk.f32.vlgmr.msra.gmra.mrb[8].mxu1 %vm355_vm0, %v859_v39 }
 0x31f   : > { %2686 = vmatprep.mubr.msk.f32.mxu0 %vm355_vm0, %v3468_v10  ;;  %2808 = vmatprep.subr.bf16.mxu0 %v3463_v9 }
 0x320   : > { %2679 = vmatprep.mubr.msk.f32.mxu1 %vm3185_vm1, %v3186_v51 }
 0x321   : > { %2687 = vmatmul.mubr.msk.f32.vlgmr.msra.gmra.mrb[12].mxu0 %vm355_vm0, %v341_v17 }
 0x322   : > { %2810 = vmatpush3.bf16.msra.mxu0 %v3463_v9 }
 0x3ed   : > { %v2653_v42 = vpop.f32.mrb[6].mxu1 }
 0x3ee   : > { %v1015_v43 = vpop.f32.mrb[7].mxu1 }
 0x3ef   : > { %v2939_v44 = vpack.i.bf16 %v2653_v42, %v1015_v43 }
 0x3f0   : > { %v2674_v45 = vpop.f32.mrb[10].mxu0 }
 0x3f1   : > { %v1258_v47 = vpop.f32.mrb[11].mxu0  ;;  %2940 = vrot.lane.b32.xlu0 %v2939_v44, %s3184_s11  ;;  %v2667_v48 = vpop.f32.mrb[8].mxu1 }
 0x3f2   : > { %v2954_v49 = vpack.i.bf16 %v2674_v45, %v1258_v47  ;;  %v1177_v50 = vpop.f32.mrb[9].mxu1 }
 0x3f3   : > { %v2949_v52 = vpack.i.bf16 %v2667_v48, %v1177_v50 }
 0x3f4   : > { %v2688_v53 = vpop.f32.mrb[12].mxu0 }
 0x3f5   : > { %2945 = vrot.lane.b32.xlu0 %v2944_v41, %s3187_s20  ;;  %2950 = vrot.lane.b32.xlu1 %v2949_v52, %s3188_s30  ;;  %v1508_v54 = vpop.f32.mrb[13].mxu0 }
 0x3f6   : > { %v2811_v55 = vpack.c.bf16 %v2688_v53, %v1508_v54  ;;  %2700 = vmatprep.mubr.msk.f32.mxu0 %vm355_vm0, %v1508_v54 }
 0x3f7   : > { %2701 = vmatmul.mubr.msk.f32.vlgmr.msra.gmra.mrb[14].mxu0 %vm355_vm0, %v2688_v53 }
 0x3f8   : > { %2812 = vmatprep.subr.bf16.mxu0 %v2811_v55  ;;  %2707 = vmatprep.mubr.msk.f32.mxu0 %vm355_vm0, %v3480_v12 }
 0x3f9   : > { %2955 = vrot.lane.b32.xlu1 %v2954_v49, %s3189_s9  ;;  %2814 = vmatpush3.bf16.msra.mxu0 %v2811_v55 }
 0x3fa   : > { %2824 = vmatprep.subr.bf16.mxu0 %v3505_v23 }
 0x3ff   : > { %2708 = vmatmul.mubr.msk.f32.vlgmr.msra.gmra.mrb[14].mxu0 %vm355_vm0, %v3489_v13 }
 0x400   : > { %2826 = vmatpush3.bf16.msra.mxu0 %v3505_v23 }
 0x401   : > { %2832 = vmatprep.subr.bf16.mxu0 %v3505_v23 }
 0x463   : > { %v2941_v56 = vpop.permute.xlu0 %2940 }
 0x464   : > { %v2943_v57 = vunpack.i.h.bf16 %v2941_v56  ;;  %v2942_v58 = vunpack.i.l.bf16 %v2941_v56 }
 0x466   : > { %v1301_v63 = vsel %vm1299_vm2, %v3526_v31, %v2943_v57  ;;  %v1300_v0 = vsel %vm1299_vm2, %v3528_v32, %v2942_v58 }
 0x467   : > { %v2946_v59 = vpop.permute.xlu0 %2945  ;;  %v2951_v60 = vpop.permute.xlu1 %2950 }
 0x468   : > { %v2948_v61 = vunpack.i.h.bf16 %v2946_v59  ;;  %v2947_v62 = vunpack.i.l.bf16 %v2946_v59  ;;  %v2953_v1 = vunpack.i.h.bf16 %v2951_v60  ;;  %v2952_v2 = vunpack.i.l.bf16 %v2951_v60 }
 0x46a   : > { %v1303_v3 = vsel %vm1302_vm3, %v1300_v0, %v2947_v62  ;;  %v1304_v4 = vsel %vm1302_vm3, %v1301_v63, %v2948_v61 }
 0x46b   : > { %v2956_v7 = vpop.permute.xlu1 %2955  ;;  %v1307_v10 = vsel %vm1305_vm4, %v1304_v4, %v2953_v1  ;;  %v1306_v11 = vsel %vm1305_vm4, %v1303_v3, %v2952_v2 }
 0x46c   : > { %v2958_v8 = vunpack.i.h.bf16 %v2956_v7  ;;  %v2957_v9 = vunpack.i.l.bf16 %v2956_v7 }
 0x46e   : > { %v1309_v14 = vsel %vm1308_vm5, %v1306_v11, %v2957_v9  ;;  %v1310_v15 = vsel %vm1308_vm5, %v1307_v10, %v2958_v8 }
 0x46f   : > { %v2797_v17 = vpack.c.bf16 %v1310_v15, %v1309_v14 }
 0x471   : > { %2798 = vmatpush3.bf16.msra.mxu1 %v2797_v17 }
 0x472   : > { %2804 = vmatprep.subr.bf16.mxu1 %v2803_v16 }
 0x474   : > { %2680 = vmatmul.mubr.msk.f32.vlgmr.msra.gmra.mrb[10].mxu1 %vm355_vm0, %v3570_v18 }
 0x475   : > { %2806 = vmatpush3.bf16.msra.mxu1 %v2803_v16  ;;  %2693 = vmatprep.mubr.msk.f32.mxu1 %vm355_vm0, %v3480_v12 }
 0x476   : > { %2816 = vmatprep.subr.bf16.mxu1 %v3505_v23 }
 0x478   : > { %2694 = vmatmul.mubr.msk.f32.vlgmr.msra.gmra.mrb[2].mxu1 %vm355_vm0, %v3489_v13 }
 0x479   : > { %2818 = vmatpush3.bf16.msra.mxu1 %v3505_v23 }
 0x47a   : > { %2820 = vmatprep.subr.bf16.mxu1 %v3505_v23 }
 0x4d2   : > { %v2709_v5 = vpop.f32.mrb[14].mxu0 }
 0x4d3   : > { %v1739_v6 = vpop.f32.mrb[15].mxu0  ;;  %v1751_v27 = vmul.f32 %v2709_v5, %v2709_v5 }
 0x4d4   : > { %v1750_v13 = vmul.f32 %v1739_v6, %v1739_v6 }
 0x547   : > { %v3581_v19 = vpop.f32.mrb[10].mxu1 }
 0x548   : > { %v2681_v20 = vpop.f32.mrb[11].mxu1  ;;  %v1384_v41 = vmul.f32 %v3581_v19, %v3581_v19 }
 0x54b   : > { %v2695_v21 = vpop.f32.mrb[2].mxu1 }
 0x54c   : > { %v1753_v22 = vmul.f32 %v2709_v5, %v2695_v21  ;;  %v1583_v24 = vpop.f32.mrb[3].mxu1  ;;  %v1749_v12 = vmul.f32 %v2695_v21, %v2695_v21 }
 0x54d   : > { %v1748_v25 = vmul.f32 %v1583_v24, %v1583_v24  ;;  %v1752_v26 = vmul.f32 %v1739_v6, %v1583_v24  ;;  %2714 = vmatprep.mubr.msk.f32.mxu1 %vm355_vm0, %v1583_v24 }
 0x54e   : > { %2715 = vmatmul.mubr.msk.f32.vlgmr.msra.gmra.mrb[12].mxu1 %vm355_vm0, %v2695_v21 }
 0x54f   : > { %2822 = vmatpush3.bf16.msra.mxu1 %v3505_v23  ;;  %2721 = vmatprep.mubr.msk.f32.mxu1 %vm355_vm0, %v1739_v6 }
 0x550   : > { %2728 = vmatprep.mubr.msk.f32.mxu0 %vm355_vm0, %v1748_v25  ;;  %2828 = vmatprep.subr.bf16.mxu1 %v3505_v23 }
 0x551   : > { %2729 = vmatmul.mubr.msk.f32.vlgmr.msra.gmra.mrb[16].mxu0 %vm355_vm0, %v1749_v12 }
 0x552   : > { %2834 = vmatpush3.bf16.msra.mxu0 %v3505_v23  ;;  %2742 = vmatprep.mubr.msk.f32.mxu0 %vm355_vm0, %v1752_v26 }
 0x553   : > { %2722 = vmatmul.mubr.msk.f32.vlgmr.msra.gmra.mrb[14].mxu1 %vm355_vm0, %v2709_v5 }
 0x554   : > { %2830 = vmatpush3.bf16.msra.mxu1 %v3505_v23  ;;  %2735 = vmatprep.mubr.msk.f32.mxu1 %vm355_vm0, %v1750_v13 }
 0x555   : > { %2743 = vmatmul.mubr.msk.f32.vlgmr.msra.gmra.mrb[18].mxu0 %vm355_vm0, %v1753_v22  ;;  %2835 = vmatprep.subr.bf16.mxu1 %v3183_v46 }
 0x557   : > { %2736 = vmatmul.mubr.msk.f32.vlgmr.msra.gmra.mrb[16].mxu1 %vm355_vm0, %v1751_v27 }
 0x558   : > { %2749 = vmatprep.mubr.msk.f32.mxu1 %vm3185_vm1, %v3186_v51 }
 0x621   : > { %v2716_v28 = vpop.f32.mrb[12].mxu1 }
 0x622   : > { %v1826_v29 = vpop.f32.mrb[13].mxu1 }
 0x624   : > { %v2730_v30 = vpop.f32.mrb[16].mxu0 }
 0x625   : > { %v1988_v31 = vpop.f32.mrb[17].mxu0 }
 0x626   : > { %v2959_v32 = vpack.i.bf16 %v2730_v30, %v1988_v31  ;;  %v2723_v33 = vpop.f32.mrb[14].mxu1 }
 0x627   : > { %v1907_v34 = vpop.f32.mrb[15].mxu1 }
 0x628   : > { %v2964_v23 = vpack.i.bf16 %v2723_v33, %v1907_v34  ;;  %2960 = vrot.lane.b32.xlu1 %v2959_v32, %s3187_s20  ;;  %v2744_v35 = vpop.f32.mrb[18].mxu0 }
 0x629   : > { %v2150_v36 = vpop.f32.mrb[19].mxu0 }
 0x62a   : > { %v2974_v37 = vpack.i.bf16 %v2744_v35, %v2150_v36  ;;  %2965 = vrot.lane.b32.xlu0 %v2964_v23, %s3184_s11  ;;  %v2737_v38 = vpop.f32.mrb[16].mxu1 }
 0x62b   : > { %v2069_v39 = vpop.f32.mrb[17].mxu1 }
 0x62c   : > { %v2969_v40 = vpack.i.bf16 %v2737_v38, %v2069_v39  ;;  %2975 = vrot.lane.b32.xlu1 %v2974_v37, %s3189_s9 }
 0x62e   : > { %2970 = vrot.lane.b32.xlu0 %v2969_v40, %s3188_s30 }
 0x632   : > { %1391 = vrot.lane.b32.xlu0 %v1384_v41, %s3187_s20 }
 0x69a   : > { %v2961_v42 = vpop.permute.xlu1 %2960 }
 0x69b   : > { %v2963_v49 = vunpack.i.h.bf16 %v2961_v42  ;;  %v2962_v50 = vunpack.i.l.bf16 %v2961_v42 }
 0x69c   : > { %v2966_v43 = vpop.permute.xlu0 %2965 }
 0x69d   : > { %v2968_v44 = vunpack.i.h.bf16 %v2966_v43  ;;  %v2967_v45 = vunpack.i.l.bf16 %v2966_v43 }
 0x69e   : > { %v2976_v48 = vpop.permute.xlu1 %2975 }
 0x69f   : > { %v2192_v46 = vsel %vm1299_vm2, %v2716_v28, %v2968_v44  ;;  %v2191_v47 = vsel %vm1299_vm2, %v1826_v29, %v2967_v45  ;;  %v2978_v54 = vunpack.i.h.bf16 %v2976_v48  ;;  %v2977_v55 = vunpack.i.l.bf16 %v2976_v48 }
 0x6a0   : > { %v2971_v51 = vpop.permute.xlu0 %2970  ;;  %v2193_v56 = vsel %vm1302_vm3, %v2191_v47, %v2962_v50  ;;  %v2194_v57 = vsel %vm1302_vm3, %v2192_v46, %v2963_v49 }
 0x6a1   : > { %v2973_v52 = vunpack.i.h.bf16 %v2971_v51  ;;  %v2972_v53 = vunpack.i.l.bf16 %v2971_v51 }
 0x6a3   : > { %v2195_v58 = vsel %vm1305_vm4, %v2193_v56, %v2972_v53  ;;  %v2196_v59 = vsel %vm1305_vm4, %v2194_v57, %v2973_v52 }
 0x6a4   : > { %v1392_v60 = vpop.permute.xlu0 %1391  ;;  %v2197_v61 = vsel %vm1308_vm5, %v2195_v58, %v2977_v55  ;;  %v2198_v62 = vsel %vm1308_vm5, %v2196_v59, %v2978_v54 }
 0x6a5   : > { %v1394_v63 = vsub.f32 %v3581_v19, %v1392_v60  ;;  %v2836_v0 = vpack.c.bf16 %v2198_v62, %v2197_v61 }
 0x6a7   : > { %1403 = vrot.lane.b32.xlu0 %v1394_v63, %s3190_s13  ;;  %2837 = vmatpush3.bf16.msra.mxu1 %v2836_v0 }
 0x6aa   : > { %2750 = vmatmul.mubr.msk.f32.vlgmr.msra.gmra.mrb[18].mxu1 %vm355_vm0, %v3570_v18 }
 0x6ab   : > { %1386 = vrot.lane.b32.xlu0 %v3581_v19, %s3190_s13 }
 0x719   : > { %v1404_v1 = vpop.permute.xlu0 %1403 }
 0x71a   : > { %v1406_v2 = vadd.f32 %v1404_v1, %v1394_v63 }
 0x71c   : > { %v1407_v3 = vadd.f32 58.5225, %v1406_v2 }
 0x71d   : > { %v1387_v4 = vpop.permute.xlu0 %1386 }
 0x71e   : > { %2979 = vrcp.f32 %v1407_v3  ;;  %v1389_v7 = vmul.f32 %v1387_v4, %v3581_v19 }
 0x720   : > { %1396 = vrot.lane.b32.xlu0 %v1389_v7, %s3189_s9  ;;  %v1414_v25 = vmul.f32 2.0, %v1389_v7 }
 0x728   : > { %v2980_v8 = vpop.eup %2979 }
 0x729   : > { %1410 = vrot.lane.b32.xlu0 %v2980_v8, %s3187_s20 }
 0x72d   : > { %1416 = vrot.lane.b32.xlu0 %v1384_v41, %s3190_s13 }
 0x77d   : > { %v2265_v9 = vpop.f32.mrb[18].mxu1 }
 0x77e   : > { %v2269_v10 = vmul.f32 %v2265_v9, %v2265_v9  ;;  %v2751_v11 = vpop.f32.mrb[19].mxu1 }
 0x780   : > { %2276 = vrot.lane.b32.xlu1 %v2269_v10, %s3187_s20 }
 0x792   : > { %v1397_v14 = vpop.permute.xlu0 %1396 }
 0x793   : > { %v1399_v15 = vsub.f32 %v3581_v19, %v1397_v14  ;;  %v1415_v19 = vadd.f32 6.5025, %v1414_v25 }
 0x795   : > { %v1400_v16 = vmul.f32 2.0, %v1399_v15 }
 0x797   : > { %v1401_v17 = vadd.f32 58.5225, %v1400_v16 }
 0x79b   : > { %v1411_v18 = vpop.permute.xlu0 %1410 }
 0x79c   : > { %v1413_v5 = vmul.f32 %v1411_v18, %v1401_v17 }
 0x79e   : > { %1424 = vrot.lane.b32.xlu0 %v1413_v5, %s3191_s15 }
 0x79f   : > { %v1417_v21 = vpop.permute.xlu0 %1416 }
 0x7a0   : > { %v1419_v22 = vadd.f32 %v1417_v21, %v1384_v41 }
 0x7a2   : > { %v1420_v24 = vadd.f32 6.5025, %v1419_v22 }
 0x7a4   : > { %2981 = vrcp.f32 %v1420_v24 }
 0x7ae   : > { %v2982_v26 = vpop.eup %2981 }
 0x7af   : > { %v1422_v12 = vmul.f32 %v2982_v26, %v1415_v19 }
 0x7f2   : > { %v2277_v6 = vpop.permute.xlu1 %2276 }
 0x7f3   : > { %v2279_v20 = vsub.f32 %v2265_v9, %v2277_v6 }
 0x7f5   : > { %2288 = vrot.lane.b32.xlu1 %v2279_v20, %s3190_s13 }
 0x7f9   : > { %2271 = vrot.lane.b32.xlu1 %v2265_v9, %s3190_s13 }
 0x810   : > { %v1425_v13 = vpop.permute.xlu0 %1424 }
 0x811   : > { %v1427_v27 = vmul.f32 %v1425_v13, %v1422_v12 }
 0x813   : > { %v1429_v28 = vsel %vm1428_vm6, %v1427_v27, 0.0 }
 0x814   : > { %1430 = vadd.xlane.f32.xlu0 %v1429_v28 }
 0x867   : > { %v2289_v29 = vpop.permute.xlu1 %2288 }
 0x868   : > { %v2291_v30 = vadd.f32 %v2289_v29, %v2279_v20 }
 0x86a   : > { %v2292_v31 = vadd.f32 58.5225, %v2291_v30 }
 0x86b   : > { %v2272_v32 = vpop.permute.xlu1 %2271 }
 0x86c   : > { %2983 = vrcp.f32 %v2292_v31  ;;  %v2274_v33 = vmul.f32 %v2272_v32, %v2265_v9 }
 0x86e   : > { %2281 = vrot.lane.b32.xlu1 %v2274_v33, %s3189_s9  ;;  %v2299_v50 = vmul.f32 2.0, %v2274_v33 }
 0x870   : > { %v2300_v52 = vadd.f32 6.5025, %v2299_v50 }
 0x876   : > { %v2984_v34 = vpop.eup %2983 }
 0x877   : > { %2295 = vrot.lane.b32.xlu1 %v2984_v34, %s3187_s20 }
 0x87b   : > { %2301 = vrot.lane.b32.xlu1 %v2269_v10, %s3190_s13 }
 0x8a1   : > { %v1431_v23 = vpop.xlane.xlu0 %1430 }
 0x8a2   : > { %v1432_v35 = vrot.slane %v1431_v23, 4 }
 0x8a4   : > { %v1433_v36 = vadd.f32 %v1432_v35, %v1431_v23 }
 0x8a6   : > { %v1434_v37 = vrot.slane %v1433_v36, 2 }
 0x8a8   : > { %v1435_v38 = vadd.f32 %v1434_v37, %v1433_v36 }
 0x8aa   : > { %v1436_v39 = vrot.slane %v1435_v38, 1 }
 0x8ac   : > { %v1437_v40 = vadd.f32 %v1436_v39, %v1435_v38 }
 0x8ae   : > { %2846 = vpush %v1437_v40 }
 0x8df   : > { %s2847_s10 = spop %2846 }
 0x8e0   : > { %v2282_v41 = vpop.permute.xlu1 %2281  ;;  %s1439_s14 = smul.f32 0.027777778, %s2847_s10  ;;  %s2329_s10 = scalar_lea.sflag [#allocation4], %s3436_s12 }
 0x8e1   : > { %v2284_v42 = vsub.f32 %v2265_v9, %v2282_v41 }
 0x8e2   : > { %s1440_s11 = smax.f32 %s3192_s23, %s1439_s14  ;;  %s3193_s14 = smov [#allocation10]  }
 0x8e3   : > { %v2285_v43 = vmul.f32 2.0, %v2284_v42 }
 0x8e5   : > { %v2286_v44 = vadd.f32 58.5225, %v2285_v43 }
 0x8e9   : > { %v2296_v45 = vpop.permute.xlu1 %2295 }
 0x8ea   : > { %v2298_v46 = vmul.f32 %v2296_v45, %v2286_v44 }
 0x8ec   : > { %2309 = vrot.lane.b32.xlu1 %v2298_v46, %s3191_s15  ;;  %s3641_s15 = scalar_lea.hbm %s3692_s7, %s2497_s21 }
 0x8ed   : > { %v2302_v47 = vpop.permute.xlu1 %2301 }
 0x8ee   : > { %v2304_v48 = vadd.f32 %v2302_v47, %v2269_v10 }
 0x8f0   : > { %v2305_v49 = vadd.f32 6.5025, %v2304_v48 }
 0x8f2   : > { %2985 = vrcp.f32 %v2305_v49 }
 0x8fc   : > { %v2986_v51 = vpop.eup %2985 }
 0x8fd   : > { %v2307_v53 = vmul.f32 %v2986_v51, %v2300_v52 }
 0x95e   : > { %v2310_v54 = vpop.permute.xlu1 %2309 }
 0x95f   : > { %v2312_v55 = vmul.f32 %v2310_v54, %v2307_v53 }
 0x961   : > { %v2313_v56 = vsel %vm1428_vm6, %v2312_v55, 0.0 }
 0x962   : > { %2314 = vadd.xlane.f32.xlu1 %v2313_v56 }
 0x9ef   : > { %v2315_v57 = vpop.xlane.xlu1 %2314 }
 0x9f0   : > { %v2316_v58 = vrot.slane %v2315_v57, 4 }
 0x9f2   : > { %v2317_v59 = vadd.f32 %v2316_v58, %v2315_v57 }
 0x9f4   : > { %v2318_v60 = vrot.slane %v2317_v59, 2 }
 0x9f6   : > { %v2319_v61 = vadd.f32 %v2318_v60, %v2317_v59 }
 0x9f8   : > { %v2320_v62 = vrot.slane %v2319_v61, 1 }
 0x9fa   : > { %v2321_v63 = vadd.f32 %v2320_v62, %v2319_v61 }
 0x9fc   : > { %2848 = vpush %v2321_v63 }
 0xa2d   : > { %s2849_s8 = spop %2848 }
 0xa2e   : > { %s2323_s17 = smul.f32 0.027777778, %s2849_s8  ;;  %s3105_s8 = sshll.u32 %s3193_s14, 4  ;;  %s3106_s8 = int_to_ptr.vmem [resolvable:$false] %s3105_s8 }
 0xa2f   : > { %p3108_p12 = scmp.lt.s32.totalorder %s3643_s29, %s3106_s8 }
 0xa30   : > { %s2324_s20 = smax.f32 %s3192_s23, %s2323_s17  ;;  %s3107_s17 = scalar_lea.vmem %s3106_s8, 32 }
 0xa31   : > { %s2325_s30 = sadd.f32 %s2324_s20, %s1440_s11  ;;  %p3109_p1 = scmp.lt.s32.totalorder %s3107_s17, %s3101_s28 }
 0xa33   : > { %v2326_v0 = vstv %s2325_s30  ;;  %p3110_p2 = por %p3109_p1, %p3108_p12 }
 0xa34   : > { %2327 = vst [vmem:[%s338_s16] sm:$0x1] %v2326_v0 }
 0xa35   : > { %p3111_p4 = pnand %p3110_p2, %p3104_p7 }
 0xa37   : > { %3114 = shalt.err (!%p3111_p4)
}
 0xa38   : > { %s3115_s12 = scalar_lea.hbm %s3641_s15, 16  ;;  %s3119_s23 = scalar_lea.hbm %s3692_s7, 32 }
 0xa39   : > { %p3116_p9 = scmp.ne.s32.totalorder %s3641_s15, %s3115_s12  ;;  %p3120_p11 = scmp.lt.u32.totalorder %s3641_s15, %s3692_s7 }
 0xa3a   : > { %p3121_p13 = scmp.lt.u32.totalorder %s3119_s23, %s3115_s12  ;;  %p3123_p10 = scmp.lt.u32.totalorder %s3115_s12, %s3641_s15 }
 0xa3b   : > { %p3117_p0 = pnand %p3116_p9, %p3385_p5 }
 0xa3c   : > { %p3122_p6 = por %p3121_p13, %p3120_p11 }
 0xa3d   : > { %p3118_p8 = pneg %p3117_p0 }
 0xa3e   : > { %p3124_p3 = por %p3123_p10, %p3122_p6 }
 0xa40   : > { %p3125_p7 = pnand %p3124_p3, %p3118_p8 }
 0xa42   : > { %3128 = shalt.err (!%p3125_p7)
}
 0xa43   : > { %2864 = dma.vmem_to_hbm [thread:$0]  (%p3385_p5), %s3643_s29, 16, %s3641_s15, %s2329_s10  }
 0xa44 PF: > { %s3712_s30 = sld [smem:[#allocation15_spill]]  ;;  %s2353_s9 = sand.u32 1, %s3163_s24  }
 0xa45   : > { %p3714_p1 = scmp.ge.s32.totalorder %s3175_s27, 2  ;;  %s2354_s13 = scalar_lea.sflag [#allocation4], %s2353_s9 }
 0xa4a   : > { %p3713_p12 = scmp.ne.s32.totalorder %s3712_s30, 0 }
 0xa4c   : > { %p2881_p2 = pnand %p3714_p1, %p3713_p12 }
 0xa4e   : > { %3158 = dma.done.wait (!%p2881_p2), %s2354_s13, 16  }
 0xa4f   : > { %3160 = vsyncadd (!%p2881_p2), %s2354_s13, 4294967280  ;;  %p22_p4 = scmp.ge.s32.totalorder %s3371_s22, 4   ;;  %s3715_s24 = smov %s3167_s25 }
 0xa50   : > { %s3716_s25 = smov %s3171_s26  ;;  %s3717_s26 = smov %s3381_s18 }
 0xa51   : > { %s3718_s27 = smov %s3371_s22  ;;  %24 = sbr.rel (!%p22_p4) target bundleno = 7 (0x7), region = 105 }
 0xa58   :  { %2358 = vsyncpa [#allocation3], 1 }
 0xa59   :  { %2360 = vsyncpa [#allocation3 + $0x1], 1 }
 0xa5a   :  { %2361 = vsyncpa [#allocation6], 1 }
 0xa5b   :  { %2362 = vsyncpa [#allocation9], 1 }
 0xa5c   :  { %2363 = vsyncpa [#allocation4], 1 }
 0xa5d   :  { %2365 = vsyncpa [#allocation4 + $0x1], 1 }

</bundles_post_ra>
